<compile_context>
chip_gen: v7x
topology: tpu7x:2x2x1
jax: 0.10.0
libtpu: 0.0.40
codegen_flags: <defaults>
</compile_context>

<pallas_src>
import functools

import jax
import jax.numpy as jnp
from jax.experimental import pallas as pl
from jax.experimental.pallas import tpu as pltpu


def vae_kernel(x_ref, eps_ref,
               w1_ref, b1_ref,
               we_ref, be_ref,      # fused fc21|fc22: (H, 2H), (1, 2H)
               w3_ref, b3_ref,
               w4_ref, b4_ref,
               out_ref):            # fused (TB, D + 2H): recon | mu | logvar
    bf16 = jnp.bfloat16
    f32 = jnp.float32
    H = we_ref.shape[0]
    D = w4_ref.shape[0]

    # In-kernel f32 -> bf16 cast of the batch tile (free VPU op, mem-bound).
    x = x_ref[...].astype(bf16)                                     # (TB, D)

    # encode: h1 = relu(fc1(x))   (bf16 operands, f32 MXU accumulation)
    h1 = jnp.dot(x, w1_ref[...], preferred_element_type=f32) + b1_ref[...]
    h1 = jnp.maximum(h1, 0.0)

    # fused fc21|fc22 -> one lane-dense (TB, 2H) tile; cols [:H]=mu, [H:]=logvar
    ml = jnp.dot(h1.astype(bf16), we_ref[...],
                 preferred_element_type=f32) + be_ref[...]
    mu = ml[:, :H]
    logvar = ml[:, H:]

    # reparameterize in f32: z = mu + eps * exp(0.5 * logvar)   (exp on EUP)
    z = mu + eps_ref[...] * jnp.exp(0.5 * logvar)

    # decoder: recon = fc4(relu(fc3(z)))   (NO sigmoid in the spec module)
    h3 = jnp.dot(z.astype(bf16), w3_ref[...],
                 preferred_element_type=f32) + b3_ref[...]
    h3 = jnp.maximum(h3, 0.0)
    recon = jnp.dot(h3.astype(bf16), w4_ref[...],
                    preferred_element_type=f32) + b4_ref[...]

    # One fused bf16 output tile; both slice-stores are lane-128 aligned when
    # D and H are multiples of 128 (unmasked vst).
    out_ref[:, :D] = recon.astype(out_ref.dtype)
    out_ref[:, D:] = ml.astype(out_ref.dtype)


def prepare_params(params):
    """One-time param prep (call ONCE, outside the per-step forward):
    fuse fc21|fc22 into a single (H, 2H) weight and cast weights to bf16,
    biases to f32."""
    bf16, f32 = jnp.bfloat16, jnp.float32
    return dict(
        w1=params["w1"].astype(bf16),
        b1=params["b1"].astype(f32),
        we=jnp.concatenate([params["w21"], params["w22"]], axis=1).astype(bf16),
        be=jnp.concatenate([params["b21"], params["b22"]], axis=1).astype(f32),
        w3=params["w3"].astype(bf16),
        b3=params["b3"].astype(f32),
        w4=params["w4"].astype(bf16),
        b4=params["b4"].astype(f32),
    )


def _vmem_limit_bytes(tb, D, H):
    """Tile-size-derived scoped-VMEM request, capped so it is safe on every
    generation (<=48 MiB fits v7x's 64 MiB; v5e/v6e have 128 MiB)."""
    bf16_b, f32_b = 2, 4
    streams = 2 * (tb * D * f32_b            # x (double-buffered)
                   + tb * H * f32_b          # eps
                   + tb * (D + 2 * H) * bf16_b)  # fused output
    weights = 2 * ((D * H + H * 2 * H + H * D + D * D) * bf16_b
                   + (H + 2 * H + D + D) * f32_b)
    scratch = 6 * tb * max(D, 2 * H) * f32_b + (4 << 20)
    est = streams + weights + scratch
    return int(min(max(est, 16 << 20), 48 << 20))


@functools.partial(jax.jit, static_argnames=("tb",))
def vae_forward(x, eps, prep, *, tb=256):
    """x: (B, D) f32, eps: (B, H) f32, prep: output of prepare_params()."""
    B, D = x.shape
    H = prep["w1"].shape[1]
    bf16 = jnp.bfloat16

    # Batch tiling; pad only if the batch is not already a multiple of tb.
    tb = min(tb, -(-B // 8) * 8)
    pad = (-B) % tb
    if pad:
        x = jnp.pad(x, ((0, pad), (0, 0)))
        eps = jnp.pad(eps, ((0, pad), (0, 0)))
    Bp = B + pad
    grid = (Bp // tb,)

    def batch_spec(d):
        return pl.BlockSpec((tb, d), lambda i: (i, 0))

    def resident_spec(shape):
        # Same block index every step -> weights stay resident in VMEM.
        return pl.BlockSpec(shape, lambda i: (0, 0))

    flops = 2 * Bp * (D * H + H * (2 * H) + H * D + D * D)
    transcendentals = Bp * H  # exp in reparameterization
    bytes_accessed = (
        Bp * D * 4 + Bp * H * 4                      # x, eps (f32 reads)
        + (D * H + 2 * H * H + H * D + D * D) * 2    # weights (bf16)
        + (H + 2 * H + D + D) * 4                    # biases (f32)
        + Bp * (D + 2 * H) * 2                       # fused bf16 output
    )

    fused = pl.pallas_call(
        vae_kernel,
        out_shape=jax.ShapeDtypeStruct((Bp, D + 2 * H), bf16),
        grid_spec=pltpu.PrefetchScalarGridSpec(
            num_scalar_prefetch=0,
            grid=grid,
            in_specs=[
                batch_spec(D),               # x
                batch_spec(H),               # eps
                resident_spec((D, H)),       # w1
                resident_spec((1, H)),       # b1
                resident_spec((H, 2 * H)),   # w_enc (fc21|fc22)
                resident_spec((1, 2 * H)),   # b_enc
                resident_spec((H, D)),       # w3
                resident_spec((1, D)),       # b3
                resident_spec((D, D)),       # w4
                resident_spec((1, D)),       # b4
            ],
            out_specs=batch_spec(D + 2 * H),
        ),
        compiler_params=pltpu.CompilerParams(
            dimension_semantics=("parallel",),
            vmem_limit_bytes=_vmem_limit_bytes(tb, D, H),
        ),
        cost_estimate=pl.CostEstimate(
            flops=flops,
            transcendentals=transcendentals,
            bytes_accessed=bytes_accessed,
        ),
    )(x, eps, prep["w1"], prep["b1"], prep["we"], prep["be"],
      prep["w3"], prep["b3"], prep["w4"], prep["b4"])

    recon = fused[:B, :D]
    mu = fused[:B, D:D + H]
    logvar = fused[:B, D + H:]
    return recon, mu, logvar


def init_params(key, input_dim, hidden_dim):
    """Deterministic init. Weights stored as (in, out) = W.T of PyTorch."""
    ks = jax.random.split(key, 10)

    def linear(kw, kb, fan_in, fan_out):
        bound = 1.0 / jnp.sqrt(fan_in)
        w = jax.random.uniform(kw, (fan_in, fan_out), jnp.float32, -bound, bound)
        b = jax.random.uniform(kb, (1, fan_out), jnp.float32, -bound, bound)
        return w, b

    w1, b1 = linear(ks[0], ks[1], input_dim, hidden_dim)     # fc1
    w21, b21 = linear(ks[2], ks[3], hidden_dim, hidden_dim)  # fc21
    w22, b22 = linear(ks[4], ks[5], hidden_dim, hidden_dim)  # fc22
    w3, b3 = linear(ks[6], ks[7], hidden_dim, input_dim)     # fc3
    w4, b4 = linear(ks[8], ks[9], input_dim, input_dim)      # fc4
    return dict(w1=w1, b1=b1, w21=w21, b21=b21, w22=w22, b22=b22,
                w3=w3, b3=b3, w4=w4, b4=b4)


def vae_forward_ref(x, eps, p):
    """Plain-JAX reference with the same bf16-operand / f32-accum matmuls."""
    bf16, f32 = jnp.bfloat16, jnp.float32
    h1 = jnp.maximum(
        jnp.dot(x.astype(bf16), p["w1"].astype(bf16),
                preferred_element_type=f32) + p["b1"], 0.0)
    mu = jnp.dot(h1.astype(bf16), p["w21"].astype(bf16),
                 preferred_element_type=f32) + p["b21"]
    logvar = jnp.dot(h1.astype(bf16), p["w22"].astype(bf16),
                     preferred_element_type=f32) + p["b22"]
    z = mu + eps * jnp.exp(0.5 * logvar)
    h3 = jnp.maximum(
        jnp.dot(z.astype(bf16), p["w3"].astype(bf16),
                preferred_element_type=f32) + p["b3"], 0.0)
    recon = jnp.dot(h3.astype(bf16), p["w4"].astype(bf16),
                    preferred_element_type=f32) + p["b4"]
    return recon, mu, logvar


if __name__ == "__main__":
    # Lane-dense sizes per the perf review: D and H multiples of 128, batch
    # large enough that TB=256 gives 8 grid steps (4 per TensorCore on v7x).
    B, INPUT_DIM, HIDDEN_DIM = 2048, 256, 128

    key = jax.random.PRNGKey(0)
    k_x, k_eps, k_p = jax.random.split(key, 3)

    x = jax.random.normal(k_x, (B, INPUT_DIM), jnp.float32)
    eps = jax.random.normal(k_eps, (B, HIDDEN_DIM), jnp.float32)  # randn_like(std)
    params = init_params(k_p, INPUT_DIM, HIDDEN_DIM)

    prep = prepare_params(params)   # one-time weight fuse/cast (not per call)

    recon, mu, logvar = vae_forward(x, eps, prep, tb=256)
    jax.block_until_ready((recon, mu, logvar))

    recon_r, mu_r, logvar_r = vae_forward_ref(x, eps, params)

    # bf16 outputs + bf16 MXU operands -> bf16-appropriate tolerances.
    # mu/logvar are one matmul deep; recon is 4 matmuls + EUP exp deep, so it
    # accumulates a few extra 1e-3 of legitimate MXU/EUP-vs-XLA drift.
    assert jnp.allclose(mu.astype(jnp.float32), mu_r, atol=2e-2, rtol=2e-2)
    assert jnp.allclose(logvar.astype(jnp.float32), logvar_r, atol=2e-2, rtol=2e-2)
    assert jnp.allclose(recon.astype(jnp.float32), recon_r, atol=5e-2, rtol=5e-2)

    print("KERNEL_OK")
</pallas_src>

<mosaic_0001>
module attributes {stable_mosaic.version = 11 : i64} {
  func.func @vae_kernel(%arg0: i32, %arg1: memref<256x256xf32, #tpu.memory_space<vmem>>, %arg2: memref<256x128xf32, #tpu.memory_space<vmem>>, %arg3: memref<256x128xbf16, #tpu.memory_space<vmem>>, %arg4: memref<1x128xf32, #tpu.memory_space<vmem>>, %arg5: memref<128x256xbf16, #tpu.memory_space<vmem>>, %arg6: memref<1x256xf32, #tpu.memory_space<vmem>>, %arg7: memref<128x256xbf16, #tpu.memory_space<vmem>>, %arg8: memref<1x256xf32, #tpu.memory_space<vmem>>, %arg9: memref<256x256xbf16, #tpu.memory_space<vmem>>, %arg10: memref<1x256xf32, #tpu.memory_space<vmem>>, %arg11: memref<256x512xbf16, #tpu.memory_space<vmem>>) attributes {dimension_semantics = [#tpu.dimension_semantics<parallel>], iteration_bounds = array<i64: 8>, scalar_prefetch = 0 : i64, scratch_operands = 0 : i64, tpu.core_type = #tpu.core_type<tc>, window_params = [{transform_indices = @transform_0, window_bounds = array<i64: 256, 256>}, {transform_indices = @transform_1, window_bounds = array<i64: 256, 128>}, {pipeline_mode = #tpu.pipeline_mode<synchronous>, transform_indices = @transform_2, window_bounds = array<i64: 256, 128>}, {pipeline_mode = #tpu.pipeline_mode<synchronous>, transform_indices = @transform_3, window_bounds = array<i64: 1, 128>}, {pipeline_mode = #tpu.pipeline_mode<synchronous>, transform_indices = @transform_4, window_bounds = array<i64: 128, 256>}, {pipeline_mode = #tpu.pipeline_mode<synchronous>, transform_indices = @transform_5, window_bounds = array<i64: 1, 256>}, {pipeline_mode = #tpu.pipeline_mode<synchronous>, transform_indices = @transform_6, window_bounds = array<i64: 128, 256>}, {pipeline_mode = #tpu.pipeline_mode<synchronous>, transform_indices = @transform_7, window_bounds = array<i64: 1, 256>}, {pipeline_mode = #tpu.pipeline_mode<synchronous>, transform_indices = @transform_8, window_bounds = array<i64: 256, 256>}, {pipeline_mode = #tpu.pipeline_mode<synchronous>, transform_indices = @transform_9, window_bounds = array<i64: 1, 256>}, {transform_indices = @transform_10, window_bounds = array<i64: 256, 512>}]} {
    %c0 = arith.constant 0 : index
    %c0_0 = arith.constant 0 : index
    %0 = vector.load %arg1[%c0, %c0_0] : memref<256x256xf32, #tpu.memory_space<vmem>>, vector<256x256xf32>
    %1 = arith.truncf %0 : vector<256x256xf32> to vector<256x256xbf16>
    %c0_1 = arith.constant 0 : index
    %c0_2 = arith.constant 0 : index
    %2 = vector.load %arg3[%c0_1, %c0_2] : memref<256x128xbf16, #tpu.memory_space<vmem>>, vector<256x128xbf16>
    %cst = arith.constant dense<0.000000e+00> : vector<256x128xf32>
    %3 = tpu.matmul %1, %2, %cst {dimension_numbers = #tpu.dot_dimension_numbers<[1], [0], [0], [1], [0, 0, 1, 1], [], []>} : vector<256x256xbf16>, vector<256x128xbf16>, vector<256x128xf32> -> vector<256x128xf32>
    %c0_3 = arith.constant 0 : index
    %c0_4 = arith.constant 0 : index
    %4 = vector.load %arg4[%c0_3, %c0_4] : memref<1x128xf32, #tpu.memory_space<vmem>>, vector<1x128xf32>
    %5 = vector.broadcast %4 : vector<1x128xf32> to vector<256x128xf32>
    %6 = arith.addf %3, %5 : vector<256x128xf32>
    %cst_5 = arith.constant 0.000000e+00 : f32
    %7 = vector.broadcast %cst_5 : f32 to vector<256x128xf32>
    %8 = arith.maximumf %6, %7 : vector<256x128xf32>
    %9 = arith.truncf %8 : vector<256x128xf32> to vector<256x128xbf16>
    %c0_6 = arith.constant 0 : index
    %c0_7 = arith.constant 0 : index
    %10 = vector.load %arg5[%c0_6, %c0_7] : memref<128x256xbf16, #tpu.memory_space<vmem>>, vector<128x256xbf16>
    %cst_8 = arith.constant dense<0.000000e+00> : vector<256x256xf32>
    %11 = tpu.matmul %9, %10, %cst_8 {dimension_numbers = #tpu.dot_dimension_numbers<[1], [0], [0], [1], [0, 0, 1, 1], [], []>} : vector<256x128xbf16>, vector<128x256xbf16>, vector<256x256xf32> -> vector<256x256xf32>
    %c0_9 = arith.constant 0 : index
    %c0_10 = arith.constant 0 : index
    %12 = vector.load %arg6[%c0_9, %c0_10] : memref<1x256xf32, #tpu.memory_space<vmem>>, vector<1x256xf32>
    %13 = vector.broadcast %12 : vector<1x256xf32> to vector<256x256xf32>
    %14 = arith.addf %11, %13 : vector<256x256xf32>
    %15 = vector.extract_strided_slice %14 {offsets = [0, 0], sizes = [256, 128], strides = [1, 1]} : vector<256x256xf32> to vector<256x128xf32>
    %16 = vector.extract_strided_slice %14 {offsets = [0, 128], sizes = [256, 128], strides = [1, 1]} : vector<256x256xf32> to vector<256x128xf32>
    %c0_11 = arith.constant 0 : index
    %c0_12 = arith.constant 0 : index
    %17 = vector.load %arg2[%c0_11, %c0_12] : memref<256x128xf32, #tpu.memory_space<vmem>>, vector<256x128xf32>
    %cst_13 = arith.constant 5.000000e-01 : f32
    %18 = vector.broadcast %cst_13 : f32 to vector<256x128xf32>
    %19 = arith.mulf %18, %16 : vector<256x128xf32>
    %20 = math.exp %19 : vector<256x128xf32>
    %21 = arith.mulf %17, %20 : vector<256x128xf32>
    %22 = arith.addf %15, %21 : vector<256x128xf32>
    %23 = arith.truncf %22 : vector<256x128xf32> to vector<256x128xbf16>
    %c0_14 = arith.constant 0 : index
    %c0_15 = arith.constant 0 : index
    %24 = vector.load %arg7[%c0_14, %c0_15] : memref<128x256xbf16, #tpu.memory_space<vmem>>, vector<128x256xbf16>
    %cst_16 = arith.constant dense<0.000000e+00> : vector<256x256xf32>
    %25 = tpu.matmul %23, %24, %cst_16 {dimension_numbers = #tpu.dot_dimension_numbers<[1], [0], [0], [1], [0, 0, 1, 1], [], []>} : vector<256x128xbf16>, vector<128x256xbf16>, vector<256x256xf32> -> vector<256x256xf32>
    %c0_17 = arith.constant 0 : index
    %c0_18 = arith.constant 0 : index
    %26 = vector.load %arg8[%c0_17, %c0_18] : memref<1x256xf32, #tpu.memory_space<vmem>>, vector<1x256xf32>
    %27 = vector.broadcast %26 : vector<1x256xf32> to vector<256x256xf32>
    %28 = arith.addf %25, %27 : vector<256x256xf32>
    %cst_19 = arith.constant 0.000000e+00 : f32
    %29 = vector.broadcast %cst_19 : f32 to vector<256x256xf32>
    %30 = arith.maximumf %28, %29 : vector<256x256xf32>
    %31 = arith.truncf %30 : vector<256x256xf32> to vector<256x256xbf16>
    %c0_20 = arith.constant 0 : index
    %c0_21 = arith.constant 0 : index
    %32 = vector.load %arg9[%c0_20, %c0_21] : memref<256x256xbf16, #tpu.memory_space<vmem>>, vector<256x256xbf16>
    %cst_22 = arith.constant dense<0.000000e+00> : vector<256x256xf32>
    %33 = tpu.matmul %31, %32, %cst_22 {dimension_numbers = #tpu.dot_dimension_numbers<[1], [0], [0], [1], [0, 0, 1, 1], [], []>} : vector<256x256xbf16>, vector<256x256xbf16>, vector<256x256xf32> -> vector<256x256xf32>
    %c0_23 = arith.constant 0 : index
    %c0_24 = arith.constant 0 : index
    %34 = vector.load %arg10[%c0_23, %c0_24] : memref<1x256xf32, #tpu.memory_space<vmem>>, vector<1x256xf32>
    %35 = vector.broadcast %34 : vector<1x256xf32> to vector<256x256xf32>
    %36 = arith.addf %33, %35 : vector<256x256xf32>
    %37 = arith.truncf %36 : vector<256x256xf32> to vector<256x256xbf16>
    %c0_25 = arith.constant 0 : index
    %c0_26 = arith.constant 0 : index
    %38 = vector.load %arg11[%c0_25, %c0_26] : memref<256x512xbf16, #tpu.memory_space<vmem>>, vector<256x256xbf16>
    tpu.vector_store %arg11[%c0_25, %c0_26], %37 {strides = array<i32>} : memref<256x512xbf16, #tpu.memory_space<vmem>>, vector<256x256xbf16>,
    %39 = arith.truncf %14 : vector<256x256xf32> to vector<256x256xbf16>
    %c0_27 = arith.constant 0 : index
    %c256 = arith.constant 256 : index
    %40 = vector.load %arg11[%c0_27, %c256] : memref<256x512xbf16, #tpu.memory_space<vmem>>, vector<256x256xbf16>
    tpu.vector_store %arg11[%c0_27, %c256], %39 {strides = array<i32>} : memref<256x512xbf16, #tpu.memory_space<vmem>>, vector<256x256xbf16>,
    return
  }
  func.func @transform_0(%arg0: i32) -> (i32, i32) {
    %c0_i32 = arith.constant 0 : i32
    %c0_i32_0 = arith.constant 0 : i32
    return %arg0, %c0_i32 : i32, i32
  }
  func.func @transform_1(%arg0: i32) -> (i32, i32) {
    %c0_i32 = arith.constant 0 : i32
    %c0_i32_0 = arith.constant 0 : i32
    return %arg0, %c0_i32 : i32, i32
  }
  func.func @transform_2(%arg0: i32) -> (i32, i32) {
    %c0_i32 = arith.constant 0 : i32
    %c0_i32_0 = arith.constant 0 : i32
    %c0_i32_1 = arith.constant 0 : i32
    return %c0_i32, %c0_i32_0 : i32, i32
  }
  func.func @transform_3(%arg0: i32) -> (i32, i32) {
    %c0_i32 = arith.constant 0 : i32
    %c0_i32_0 = arith.constant 0 : i32
    %c0_i32_1 = arith.constant 0 : i32
    return %c0_i32, %c0_i32_0 : i32, i32
  }
  func.func @transform_4(%arg0: i32) -> (i32, i32) {
    %c0_i32 = arith.constant 0 : i32
    %c0_i32_0 = arith.constant 0 : i32
    %c0_i32_1 = arith.constant 0 : i32
    return %c0_i32, %c0_i32_0 : i32, i32
  }
  func.func @transform_5(%arg0: i32) -> (i32, i32) {
    %c0_i32 = arith.constant 0 : i32
    %c0_i32_0 = arith.constant 0 : i32
    %c0_i32_1 = arith.constant 0 : i32
    return %c0_i32, %c0_i32_0 : i32, i32
  }
  func.func @transform_6(%arg0: i32) -> (i32, i32) {
    %c0_i32 = arith.constant 0 : i32
    %c0_i32_0 = arith.constant 0 : i32
    %c0_i32_1 = arith.constant 0 : i32
    return %c0_i32, %c0_i32_0 : i32, i32
  }
  func.func @transform_7(%arg0: i32) -> (i32, i32) {
    %c0_i32 = arith.constant 0 : i32
    %c0_i32_0 = arith.constant 0 : i32
    %c0_i32_1 = arith.constant 0 : i32
    return %c0_i32, %c0_i32_0 : i32, i32
  }
  func.func @transform_8(%arg0: i32) -> (i32, i32) {
    %c0_i32 = arith.constant 0 : i32
    %c0_i32_0 = arith.constant 0 : i32
    %c0_i32_1 = arith.constant 0 : i32
    return %c0_i32, %c0_i32_0 : i32, i32
  }
  func.func @transform_9(%arg0: i32) -> (i32, i32) {
    %c0_i32 = arith.constant 0 : i32
    %c0_i32_0 = arith.constant 0 : i32
    %c0_i32_1 = arith.constant 0 : i32
    return %c0_i32, %c0_i32_0 : i32, i32
  }
  func.func @transform_10(%arg0: i32) -> (i32, i32) {
    %c0_i32 = arith.constant 0 : i32
    %c0_i32_0 = arith.constant 0 : i32
    return %arg0, %c0_i32 : i32, i32
  }
}

</mosaic_0001>

<bundles_post_ra>
// kernel: vae_forward.1
= control target key start
LH: loop header
LB: loop body
LE: loop exit
PB: predicated region body
PF: predicated region fallthrough
CT: control target
= control target key end

     0   :  { %s4916_s0 = inlined_call_operand.hbm [shape: f32[2048,256], index: 0, kind: input, shape index: {}]   ;;  %s4917_s1 = inlined_call_operand.hbm [shape: f32[2048,128], index: 1, kind: input, shape index: {}]   ;;  %s4918_s2 = inlined_call_operand.hbm [shape: bf16[256,128], index: 2, kind: input, shape index: {}]   ;;  %s4919_s3 = inlined_call_operand.hbm [shape: f32[1,128], index: 3, kind: input, shape index: {}]   ;;  %s4920_s4 = inlined_call_operand.hbm [shape: bf16[128,256], index: 4, kind: input, shape index: {}]   ;;  %s4921_s5 = inlined_call_operand.hbm [shape: f32[1,256], index: 5, kind: input, shape index: {}]   ;;  %s4922_s6 = inlined_call_operand.hbm [shape: bf16[128,256], index: 6, kind: input, shape index: {}]   ;;  %s4923_s7 = inlined_call_operand.hbm [shape: f32[1,256], index: 7, kind: input, shape index: {}]   ;;  %s4924_s8 = inlined_call_operand.hbm [shape: bf16[256,256], index: 8, kind: input, shape index: {}]   ;;  %s4925_s9 = inlined_call_operand.hbm [shape: f32[1,256], index: 9, kind: input, shape index: {}]   ;;  %s4926_s10 = inlined_call_operand.vmem [shape: bf16[2048,512], index: 10, kind: output, shape index: {}]  }
   0x1   :  { %4932 = sst [smem:[#allocation26_spill]] %s4916_s0 }
   0x2   :  { %4933 = sst [smem:[#allocation27_spill]] %s4918_s2 }
   0x3   :  { %4934 = sst [smem:[#allocation28_spill]] %s4919_s3 }
   0x4   :  { %4935 = sst [smem:[#allocation29_spill]] %s4926_s10 }
   0x5   :  { %15 = vsyncpa [#allocation3], 0 }
   0x6   :  { %17 = vsyncpa [#allocation3 + $0x1], 0 }
   0x7   :  { %18 = vsyncpa [#allocation5], 0 }
   0x8   :  { %20 = vsyncpa [#allocation5 + $0x1], 0 }
   0x9   :  { %21 = vsyncpa [#allocation8], 0 }
   0xa   :  { %22 = vsyncpa [#allocation11], 0 }
   0xb   :  { %23 = vsyncpa [#allocation14], 0 }
   0xc   :  { %24 = vsyncpa [#allocation17], 0  ;;  %s3978_s13 = smov 0   ;;  %s3980_s14 = smov 0  }
   0xd   :  { %s3982_s15 = smov 0   ;;  %s3984_s16 = smov 0  }
   0xe LB: > { %s3906_s17 = smov [#allocation6]   ;;  %s3999_s19 = sadd.s32 4294967295, %s3904_s16   ;;  %s3904_s16 = sphi %s3984_s16, %s4964_s16   ;;  %s3900_s15 = sphi %s3982_s15, %s4963_s15   ;;  %s3896_s14 = sphi %s3980_s14, %s4962_s14   ;;  %s3892_s13 = sphi %s3978_s13, %s4961_s13  }
   0xf   : > { %s293_s18 = sshll.u32 %s3906_s17, 4  ;;  %p2896_p0 = scmp.ge.s32.totalorder %s3904_s16, 1  ;;  %s4004_s18 = int_to_ptr.vmem [resolvable:$true] %s293_s18 }
  0x10   : > { %p4928_p1 = scmp.eq.s32.totalorder %s3999_s19, 0  ;;  %p281_p2 = scmp.lt.s32.totalorder %s3904_s16, 9 }
  0x11   : > { %s3907_s21 = smov [#allocation7]   ;;  %s3908_s24 = smov [#allocation10]  }
  0x12   : > { %p4006_p3 = pnand %p2896_p0, %p281_p2  ;;  %s307_s22 = sshll.u32 %s3907_s21, 4  ;;  %s4018_s22 = int_to_ptr.vmem [resolvable:$true] %s307_s22 }
  0x13   : > { %s331_s25 = sshll.u32 %s3908_s24, 4  ;;  %s4939_s2 = sld [smem:[#allocation27_spill]]  ;;  %s4020_s25 = int_to_ptr.vmem [resolvable:$true] %s331_s25 }
  0x14   : > { %s4936_s20 = scalar_select %p4006_p3, 1, 0 }
  0x15   : > { %p3290_p4 = pneg %p4006_p3 }
  0x16   : > { %4937 = sst [smem:[#allocation25_spill]] %s4936_s20 }
  0x17   : > { %p4014_p5 = pnand %p3290_p4, %p4928_p1 }
  0x19   : > { %s3562_s28 = scalar_lea.hbm %s4939_s2, 2048  ;;  %p4030_p7 = pneg %p4014_p5 }
  0x1a   : > { %p3563_p6 = scmp.ne.s32.totalorder %s4939_s2, %s3562_s28  ;;  %p3569_p10 = scmp.lt.u32.totalorder %s3562_s28, %s4939_s2 }
  0x1c   : > { %p3565_p8 = pnand %p4030_p7, %p3563_p6 }
  0x1e   : > { %p3566_p9 = pneg %p3565_p8 }
  0x20   : > { %p3571_p11 = pnand %p3569_p10, %p3566_p9 }
  0x22   : > { %3574 = shalt.err (!%p3571_p11)
}
  0x23   : > { %s3575_s21 = scalar_lea.vmem %s4004_s18, 2048  ;;  %p3583_p2 = scmp.lt.s32.totalorder %s4004_s18, %s4004_s18 }
  0x24   : > { %p3576_p12 = scmp.ne.s32.totalorder %s4004_s18, %s3575_s21  ;;  %p3584_p4 = scmp.lt.s32.totalorder %s3575_s21, %s3575_s21 }
  0x26   : > { %p3578_p13 = pnand %p3576_p12, %p4030_p7  ;;  %p3585_p6 = por %p3584_p4, %p3583_p2 }
  0x28   : > { %p3579_p0 = pneg %p3578_p13 }
  0x2a   : > { %p3586_p8 = pnand %p3585_p6, %p3579_p0 }
  0x2c   : > { %3589 = shalt.err (!%p3586_p8)
}
  0x2d   : > { %s3909_s24 = smov 64   ;;  %s3910_s26 = smov 4  }
  0x2e   : > { %3293 = dma.hbm_to_vmem [thread:$0]  (!%p4014_p5), %s4939_s2, 2048, %s4004_s18, [#allocation5], %s3909_s24, %s3909_s24, %s3910_s26  }
  0x2f   : > { %s4941_s3 = sld [smem:[#allocation28_spill]] }
  0x35   : > { %s3590_s12 = scalar_lea.hbm %s4941_s3, 16 }
  0x36   : > { %p3591_p9 = scmp.ne.s32.totalorder %s4941_s3, %s3590_s12  ;;  %p3597_p12 = scmp.lt.u32.totalorder %s3590_s12, %s4941_s3 }
  0x38   : > { %p3593_p10 = pnand %p3591_p9, %p4030_p7 }
  0x3a   : > { %p3594_p11 = pneg %p3593_p10 }
  0x3c   : > { %p3599_p13 = pnand %p3597_p12, %p3594_p11 }
  0x3e   : > { %3602 = shalt.err (!%p3599_p13)
}
  0x3f   : > { %s3603_s18 = scalar_lea.vmem %s4018_s22, 16  ;;  %s3610_s10 = scalar_lea.vmem %s4018_s22, 32 }
  0x40   : > { %p3604_p0 = scmp.ne.s32.totalorder %s4018_s22, %s3603_s18  ;;  %p3611_p6 = scmp.lt.s32.totalorder %s4018_s22, %s4018_s22 }
  0x41   : > { %p3612_p8 = scmp.lt.s32.totalorder %s3610_s10, %s3603_s18 }
  0x42   : > { %p3606_p2 = pnand %p3604_p0, %p4030_p7 }
  0x43   : > { %p3613_p9 = por %p3612_p8, %p3611_p6 }
  0x44   : > { %p3607_p4 = pneg %p3606_p2 }
  0x46   : > { %p3614_p10 = pnand %p3613_p9, %p3607_p4 }
  0x48   : > { %3617 = shalt.err (!%p3614_p10)
}
  0x49   : > { %3296 = dma.hbm_to_vmem [thread:$0]  (!%p4014_p5), %s4941_s3, 16, %s4018_s22, [#allocation8]  }
  0x4a   : > { %s3618_s28 = scalar_lea.hbm %s4921_s5, 32 }
  0x4b   : > { %p3619_p11 = scmp.ne.s32.totalorder %s4921_s5, %s3618_s28  ;;  %p3625_p0 = scmp.lt.u32.totalorder %s3618_s28, %s4921_s5 }
  0x4d   : > { %p3621_p12 = pnand %p3619_p11, %p4030_p7 }
  0x4f   : > { %p3622_p13 = pneg %p3621_p12 }
  0x51   : > { %p3627_p2 = pnand %p3625_p0, %p3622_p13 }
  0x53   : > { %3630 = shalt.err (!%p3627_p2)
}
  0x54   : > { %s3631_s22 = scalar_lea.vmem %s4020_s25, 32  ;;  %p3639_p9 = scmp.lt.s32.totalorder %s4020_s25, %s4020_s25 }
  0x55   : > { %p3632_p4 = scmp.ne.s32.totalorder %s4020_s25, %s3631_s22  ;;  %p3640_p10 = scmp.lt.s32.totalorder %s3631_s22, %s3631_s22 }
  0x57   : > { %p3634_p6 = pnand %p3632_p4, %p4030_p7  ;;  %p3641_p11 = por %p3640_p10, %p3639_p9 }
  0x59   : > { %p3635_p8 = pneg %p3634_p6 }
  0x5b   : > { %p3642_p12 = pnand %p3641_p11, %p3635_p8 }
  0x5d   : > { %3645 = shalt.err (!%p3642_p12)
}
  0x5e   : > { %3302 = dma.hbm_to_vmem [thread:$0]  (!%p4014_p5), %s4921_s5, 32, %s4020_s25, [#allocation11]  }
  0x5f   : > { %s3911_s10 = smov [#allocation13]   ;;  %s3912_s24 = smov [#allocation9]  }
  0x60   : > { %s355_s20 = sshll.u32 %s3911_s10, 4  ;;  %s317_s26 = sshll.u32 %s3912_s24, 4  ;;  %s356_s20 = int_to_ptr.vmem [resolvable:$true] %s355_s20  ;;  %s318_s26 = int_to_ptr.vmem [resolvable:$true] %s317_s26 }
  0x61   : > { %s3646_s29 = scalar_lea.hbm %s4923_s7, 32 }
  0x62   : > { %p3647_p13 = scmp.ne.s32.totalorder %s4923_s7, %s3646_s29  ;;  %p3653_p4 = scmp.lt.u32.totalorder %s3646_s29, %s4923_s7 }
  0x64   : > { %p3649_p0 = pnand %p3647_p13, %p4030_p7 }
  0x66   : > { %p3650_p2 = pneg %p3649_p0 }
  0x68   : > { %p3655_p6 = pnand %p3653_p4, %p3650_p2 }
  0x6a   : > { %3658 = shalt.err (!%p3655_p6)
}
  0x6b   : > { %s3659_s25 = scalar_lea.vmem %s356_s20, 32  ;;  %p3667_p11 = scmp.lt.s32.totalorder %s356_s20, %s356_s20 }
  0x6c   : > { %p3660_p8 = scmp.ne.s32.totalorder %s356_s20, %s3659_s25  ;;  %p3668_p12 = scmp.lt.s32.totalorder %s3659_s25, %s3659_s25 }
  0x6e   : > { %p3662_p9 = pnand %p3660_p8, %p4030_p7  ;;  %p3669_p1 = por %p3668_p12, %p3667_p11 }
  0x70   : > { %p3663_p10 = pneg %p3662_p9 }
  0x72   : > { %p3670_p3 = pnand %p3669_p1, %p3663_p10 }
  0x74   : > { %3673 = shalt.err (!%p3670_p3)
}
  0x75   : > { %3308 = dma.hbm_to_vmem [thread:$0]  (!%p4014_p5), %s4923_s7, 32, %s356_s20, [#allocation14]  }
  0x76   : > { %s3674_s27 = scalar_lea.hbm %s4920_s4, 2048 }
  0x77   : > { %p3675_p13 = scmp.ne.s32.totalorder %s4920_s4, %s3674_s27  ;;  %p3681_p3 = scmp.lt.u32.totalorder %s3674_s27, %s4920_s4 }
  0x79   : > { %p3677_p0 = pnand %p3675_p13, %p4030_p7 }
  0x7b   : > { %p3678_p1 = pneg %p3677_p0 }
  0x7d   : > { %p3683_p2 = pnand %p3681_p3, %p3678_p1 }
  0x7f   : > { %3686 = shalt.err (!%p3683_p2)
}
  0x80   : > { %s3687_s17 = scalar_lea.vmem %s318_s26, 2048  ;;  %p3695_p9 = scmp.lt.s32.totalorder %s318_s26, %s318_s26 }
  0x81   : > { %p3688_p4 = scmp.ne.s32.totalorder %s318_s26, %s3687_s17  ;;  %p3696_p10 = scmp.lt.s32.totalorder %s3687_s17, %s3687_s17 }
  0x83   : > { %p3690_p6 = pnand %p3688_p4, %p4030_p7  ;;  %p3697_p11 = por %p3696_p10, %p3695_p9 }
  0x85   : > { %p3691_p8 = pneg %p3690_p6 }
  0x87   : > { %p3698_p12 = pnand %p3697_p11, %p3691_p8 }
  0x89   : > { %3701 = shalt.err (!%p3698_p12)
}
  0x8a   : > { %s4930_s20 = smov 128   ;;  %s4931_s22 = smov 8  }
  0x8b   : > { %3299 = dma.hbm_to_vmem [thread:$0]  (!%p4014_p5), %s4920_s4, 2048, %s318_s26, [#allocation8], %s4930_s20, %s4930_s20, %s4931_s22  }
  0x8c   : > { %s3915_s18 = smov [#allocation12]   ;;  %s3916_s24 = smov [#allocation15]  }
  0x8d   : > { %s341_s10 = sshll.u32 %s3915_s18, 4  ;;  %s365_s27 = sshll.u32 %s3916_s24, 4  ;;  %s342_s10 = int_to_ptr.vmem [resolvable:$true] %s341_s10  ;;  %s366_s27 = int_to_ptr.vmem [resolvable:$true] %s365_s27 }
  0x8e   : > { %s3702_s30 = scalar_lea.hbm %s4922_s6, 2048 }
  0x8f   : > { %p3703_p13 = scmp.ne.s32.totalorder %s4922_s6, %s3702_s30  ;;  %p3709_p3 = scmp.lt.u32.totalorder %s3702_s30, %s4922_s6 }
  0x91   : > { %p3705_p0 = pnand %p3703_p13, %p4030_p7 }
  0x93   : > { %p3706_p1 = pneg %p3705_p0 }
  0x95   : > { %p3711_p2 = pnand %p3709_p3, %p3706_p1 }
  0x97   : > { %3714 = shalt.err (!%p3711_p2)
}
  0x98   : > { %s3715_s26 = scalar_lea.vmem %s342_s10, 2048  ;;  %p3723_p9 = scmp.lt.s32.totalorder %s342_s10, %s342_s10 }
  0x99   : > { %p3716_p4 = scmp.ne.s32.totalorder %s342_s10, %s3715_s26  ;;  %p3724_p10 = scmp.lt.s32.totalorder %s3715_s26, %s3715_s26 }
  0x9b   : > { %p3718_p6 = pnand %p3716_p4, %p4030_p7  ;;  %p3725_p11 = por %p3724_p10, %p3723_p9 }
  0x9d   : > { %p3719_p8 = pneg %p3718_p6 }
  0x9f   : > { %p3726_p12 = pnand %p3725_p11, %p3719_p8 }
  0xa1   : > { %3729 = shalt.err (!%p3726_p12)
}
  0xa2   : > { %3305 = dma.hbm_to_vmem [thread:$0]  (!%p4014_p5), %s4922_s6, 2048, %s342_s10, [#allocation11], %s4930_s20, %s4930_s20, %s4931_s22  }
  0xa3   : > { %s3730_s18 = scalar_lea.hbm %s4924_s8, 4096 }
  0xa4   : > { %p3731_p13 = scmp.ne.s32.totalorder %s4924_s8, %s3730_s18  ;;  %p3737_p3 = scmp.lt.u32.totalorder %s3730_s18, %s4924_s8 }
  0xa6   : > { %p3733_p0 = pnand %p3731_p13, %p4030_p7 }
  0xa8   : > { %p3734_p1 = pneg %p3733_p0 }
  0xaa   : > { %p3739_p2 = pnand %p3737_p3, %p3734_p1 }
  0xac   : > { %3742 = shalt.err (!%p3739_p2)
}
  0xad   : > { %s3743_s12 = scalar_lea.vmem %s366_s27, 4096  ;;  %p3751_p9 = scmp.lt.s32.totalorder %s366_s27, %s366_s27 }
  0xae   : > { %p3744_p4 = scmp.ne.s32.totalorder %s366_s27, %s3743_s12  ;;  %p3752_p10 = scmp.lt.s32.totalorder %s3743_s12, %s3743_s12 }
  0xb0   : > { %p3746_p6 = pnand %p3744_p4, %p4030_p7  ;;  %p3753_p11 = por %p3752_p10, %p3751_p9 }
  0xb2   : > { %p3747_p8 = pneg %p3746_p6 }
  0xb4   : > { %p3754_p12 = pnand %p3753_p11, %p3747_p8 }
  0xb6   : > { %3757 = shalt.err (!%p3754_p12)
}
  0xb7   : > { %3311 = dma.hbm_to_vmem [thread:$0]  (!%p4014_p5), %s4924_s8, 4096, %s366_s27, [#allocation14], %s4930_s20, %s4930_s20, %s4931_s22  }
  0xb8   : > { %s3917_s26 = smov [#allocation16]   ;;  %s3758_s21 = scalar_lea.hbm %s4925_s9, 32 }
  0xb9   : > { %s379_s2 = sshll.u32 %s3917_s26, 4  ;;  %p3759_p13 = scmp.ne.s32.totalorder %s4925_s9, %s3758_s21  ;;  %s380_s2 = int_to_ptr.vmem [resolvable:$true] %s379_s2 }
  0xba   : > { %p3765_p3 = scmp.lt.u32.totalorder %s3758_s21, %s4925_s9 }
  0xbb   : > { %p3761_p0 = pnand %p3759_p13, %p4030_p7 }
  0xbd   : > { %p3762_p1 = pneg %p3761_p0 }
  0xbf   : > { %p3767_p2 = pnand %p3765_p3, %p3762_p1 }
  0xc1   : > { %3770 = shalt.err (!%p3767_p2)
}
  0xc2   : > { %s3771_s27 = scalar_lea.vmem %s380_s2, 32  ;;  %p3779_p9 = scmp.lt.s32.totalorder %s380_s2, %s380_s2 }
  0xc3   : > { %p3772_p4 = scmp.ne.s32.totalorder %s380_s2, %s3771_s27  ;;  %p3780_p10 = scmp.lt.s32.totalorder %s3771_s27, %s3771_s27 }
  0xc5   : > { %p3774_p6 = pnand %p3772_p4, %p4030_p7  ;;  %p3781_p11 = por %p3780_p10, %p3779_p9 }
  0xc7   : > { %p3775_p8 = pneg %p3774_p6 }
  0xc9   : > { %p3782_p12 = pnand %p3781_p11, %p3775_p8 }
  0xcb   : > { %3785 = shalt.err (!%p3782_p12)
}
  0xcc   : > { %3314 = dma.hbm_to_vmem [thread:$0]  (!%p4014_p5), %s4925_s9, 32, %s380_s2, [#allocation17]  }
  0xcd   : > { %s4198_s11 = sadd.s32 1, %s3904_s16   ;;  %s37_s23 = sadd.s32 1, %s3900_s15 }
  0xce   : > { %s34_s10 = ssub.s32 %s3904_s16, %s4198_s11  ;;  %p44_p7 = scmp.ne.s32.totalorder %s3900_s15, %s3896_s14 }
  0xcf   : > { %p35_p13 = scmp.eq.s32.totalorder %s34_s10, 0  ;;  %p45_p0 = scmp.eq.s32.totalorder %s3904_s16, 0 }
  0xd0   : > { %p50_p1 = scmp.ne.s32.totalorder %s3896_s14, %s3892_s13  ;;  %p3330_p3 = scmp.lt.s32.totalorder %s3904_s16, 8 }
  0xd1   : > { %s4210_s17 = scalar_select %p35_p13, %s3900_s15, %s37_s23  }
  0xd2   : > { %p46_p2 = por %p45_p0, %p44_p7  ;;  %p4942_p4 = scmp.eq.s32.totalorder %s3999_s19, 0 }
  0xd3   : > { %s4219_s3 = sand.u32 1, %s3900_s15   ;;  %s3075_s2 = sshll.u32 %s3904_s16, 13 }
  0xd4   : > { %p4214_p6 = por %p4942_p4, %p50_p1  ;;  %s2906_s25 = sshll.u32 %s4219_s3, 9 }
  0xd5   : > { %s4944_s0 = sld [smem:[#allocation26_spill]]  ;;  %s394_s13 = scalar_lea.vmem [#allocation2], %s2906_s25 }
  0xd6   : > { %s402_s28 = sshll.u32 %s394_s13, 4  ;;  %p4228_p5 = pnand %p3330_p3, %p46_p2  ;;  %s4232_s28 = int_to_ptr.vmem [resolvable:$true] %s402_s28 }
  0xd7   : > { %s391_s27 = scalar_lea.sflag [#allocation3], %s4219_s3 }
  0xd8   : > { %p3788_p9 = pneg %p4228_p5 }
  0xdb   : > { %s4226_s24 = scalar_lea.hbm %s4944_s0, %s3075_s2  ;;  %s3791_s10 = scalar_lea.hbm %s4944_s0, 65536 }
  0xdc   : > { %s3786_s30 = scalar_lea.hbm %s4226_s24, 8192  ;;  %p3792_p12 = scmp.lt.u32.totalorder %s4226_s24, %s4944_s0 }
  0xdd   : > { %p3787_p8 = scmp.ne.s32.totalorder %s4226_s24, %s3786_s30  ;;  %p3793_p7 = scmp.lt.u32.totalorder %s3791_s10, %s3786_s30 }
  0xde   : > { %p3795_p0 = scmp.lt.u32.totalorder %s3786_s30, %s4226_s24 }
  0xdf   : > { %p3789_p10 = pnand %p3788_p9, %p3787_p8  ;;  %p3794_p13 = por %p3793_p7, %p3792_p12 }
  0xe1   : > { %p3790_p11 = pneg %p3789_p10  ;;  %p3796_p1 = por %p3795_p0, %p3794_p13 }
  0xe3   : > { %p3797_p3 = pnand %p3796_p1, %p3790_p11 }
  0xe5   : > { %3800 = shalt.err (!%p3797_p3)
}
  0xe6   : > { %s3801_s21 = scalar_lea.vmem %s4232_s28, 8192  ;;  %s3918_s18 = smov [#allocation2]  }
  0xe7   : > { %p3802_p2 = scmp.ne.s32.totalorder %s4232_s28, %s3801_s21  ;;  %s3806_s13 = sshll.u32 %s3918_s18, 4  ;;  %s3807_s13 = int_to_ptr.vmem [resolvable:$false] %s3806_s13 }
  0xe8   : > { %s3808_s12 = scalar_lea.vmem %s3807_s13, 16384  ;;  %p3809_p10 = scmp.lt.s32.totalorder %s4232_s28, %s3807_s13 }
  0xe9   : > { %p3804_p4 = pnand %p3802_p2, %p3788_p9  ;;  %p3810_p12 = scmp.lt.s32.totalorder %s3808_s12, %s3801_s21 }
  0xeb   : > { %p3805_p8 = pneg %p3804_p4  ;;  %p3811_p7 = por %p3810_p12, %p3809_p10 }
  0xed   : > { %p3812_p13 = pnand %p3811_p7, %p3805_p8 }
  0xef   : > { %3815 = shalt.err (!%p3812_p13)
}
  0xf0   : > { %s3919_s30 = smov 256   ;;  %s3920_s23 = smov 16  }
  0xf1   : > { %3318 = dma.hbm_to_vmem [thread:$0]  (!%p4228_p5), %s4226_s24, 8192, %s4232_s28, %s391_s27, %s3919_s30, %s3919_s30, %s3920_s23  }
  0xf2   : > { %s412_s10 = sand.u32 1, %s3904_s16   ;;  %s2910_s2 = sshll.u32 %s4219_s3, 8 }
  0xf3   : > { %s3076_s25 = sshll.u32 %s3904_s16, 12  ;;  %s416_s21 = scalar_lea.vmem [#allocation4], %s2910_s2 }
  0xf4   : > { %s423_s18 = sshll.u32 %s416_s21, 4  ;;  %s4268_s20 = scalar_lea.hbm %s4917_s1, %s3076_s25  ;;  %s4270_s18 = int_to_ptr.vmem [resolvable:$true] %s423_s18 }
  0xf5   : > { %s4272_s22 = scalar_lea.sflag [#allocation5], %s412_s10  ;;  %s3816_s0 = scalar_lea.hbm %s4268_s20, 4096 }
  0xf6   : > { %p3817_p11 = scmp.ne.s32.totalorder %s4268_s20, %s3816_s0  ;;  %s3821_s24 = scalar_lea.hbm %s4917_s1, 32768 }
  0xf7   : > { %p3822_p3 = scmp.lt.u32.totalorder %s4268_s20, %s4917_s1  ;;  %p3823_p2 = scmp.lt.u32.totalorder %s3821_s24, %s3816_s0 }
  0xf8   : > { %p3819_p0 = pnand %p3817_p11, %p3788_p9  ;;  %p3825_p8 = scmp.lt.u32.totalorder %s3816_s0, %s4268_s20 }
  0xf9   : > { %p3824_p4 = por %p3823_p2, %p3822_p3 }
  0xfa   : > { %p3820_p1 = pneg %p3819_p0 }
  0xfb   : > { %p3826_p10 = por %p3825_p8, %p3824_p4 }
  0xfd   : > { %p3827_p12 = pnand %p3826_p10, %p3820_p1 }
  0xff   : > { %3830 = shalt.err (!%p3827_p12)
}
 0x100   : > { %s3831_s30 = scalar_lea.vmem %s4270_s18, 4096  ;;  %s3921_s23 = smov [#allocation4]  }
 0x101   : > { %p3832_p7 = scmp.ne.s32.totalorder %s4270_s18, %s3831_s30  ;;  %s3836_s10 = sshll.u32 %s3921_s23, 4  ;;  %s3837_s10 = int_to_ptr.vmem [resolvable:$false] %s3836_s10 }
 0x102   : > { %s3838_s2 = scalar_lea.vmem %s3837_s10, 8192  ;;  %p3839_p0 = scmp.lt.s32.totalorder %s4270_s18, %s3837_s10 }
 0x103   : > { %p3834_p13 = pnand %p3832_p7, %p3788_p9  ;;  %p3840_p3 = scmp.lt.s32.totalorder %s3838_s2, %s3831_s30 }
 0x105   : > { %p3835_p11 = pneg %p3834_p13  ;;  %p3841_p2 = por %p3840_p3, %p3839_p0 }
 0x107   : > { %p3842_p4 = pnand %p3841_p2, %p3835_p11 }
 0x109   : > { %3845 = shalt.err (!%p3842_p4)
}
 0x10a   : > { %s4946_s0 = smov 8   ;;  %s4947_s25 = smov 128  }
 0x10b   : > { %3321 = dma.hbm_to_vmem [thread:$0]  (!%p4228_p5), %s4268_s20, 4096, %s4270_s18, %s4272_s22, %s4947_s25, %s4947_s25, %s4946_s0  }
 0x10c   : > { %s4948_s21 = sld [smem:[#allocation25_spill]] }
 0x112   : > { %p4949_p9 = scmp.ne.s32.totalorder %s4948_s21, 0 }
 0x113   : > { %s437_s13 = sand.u32 (!%p4949_p9), 1, %s3896_s14  }
 0x114   : > { %435 = sbr.rel (%p4949_p9) target bundleno = 1359 (0x54f), region = 60  ;;  %s2914_s12 = sshll.u32 (!%p4949_p9), %s437_s13, 9 }
 0x115   : > { %s438_s16 = scalar_lea.sflag (!%p4949_p9), [#allocation3], %s437_s13  ;;  %s4304_s3 = scalar_lea.vmem (!%p4949_p9), [#allocation2], %s2914_s12 }
 0x11b   : > { %3863 = dma.done.wait (%p4214_p6), %s438_s16, 8192  }
 0x11c   : > { %3865 = vsyncadd (%p4214_p6), %s438_s16, 4294959104  ;;  %s446_s29 = sand.u32 1, %s3999_s19   ;;  %s2915_s24 = sshll.u32 %s437_s13, 8 }
 0x11d   : > { %s447_s20 = scalar_lea.sflag [#allocation5], %s446_s29  ;;  %s4311_s22 = scalar_lea.vmem [#allocation4], %s2915_s24 }
 0x11e   : > { %3867 = dma.done.wait (%p4214_p6), %s447_s20, 4096  }
 0x11f   : > { %3869 = vsyncadd (%p4214_p6), %s447_s20, 4294963200  ;;  %p4950_p5 = scmp.eq.s32.totalorder %s3999_s19, 0 }
 0x121   : > { %3871 = dma.done.wait (%p4950_p5), [#allocation5], 2048   ;;  %p4951_p1 = pmov %p4950_p5 }
 0x123   : > { %3873 = vsyncadd (%p4951_p1), [#allocation5], 4294965248  ;;  %p4952_p8 = pmov %p4951_p1 }
 0x124   : > { %p4953_p10 = pmov %p4951_p1 }
 0x125   : > { %3875 = dma.done.wait (%p4952_p8), [#allocation8], 2064  }
 0x126   : > { %3877 = vsyncadd (%p4953_p10), [#allocation8], 4294965232  ;;  %p4954_p12 = pmov %p4951_p1 }
 0x127   : > { %p4955_p7 = pmov %p4951_p1 }
 0x128   : > { %3879 = dma.done.wait (%p4954_p12), [#allocation11], 2080  }
 0x129   : > { %3881 = vsyncadd (%p4955_p7), [#allocation11], 4294965216  ;;  %p4956_p6 = pmov %p4951_p1 }
 0x12a   : > { %p4957_p13 = pmov %p4951_p1 }
 0x12b   : > { %3883 = dma.done.wait (%p4956_p6), [#allocation14], 4128  }
 0x12c   : > { %3885 = vsyncadd (%p4957_p13), [#allocation14], 4294963168  ;;  %p4958_p11 = pmov %p4951_p1 }
 0x12d   : > { %p4959_p0 = pmov %p4951_p1 }
 0x12e   : > { %3887 = dma.done.wait (%p4958_p11), [#allocation17], 32  }
 0x12f   : > { %3889 = vsyncadd (%p4959_p0), [#allocation17], 4294967264  ;;  %v3386_v0 = vld [vmem:[#allocation6 + $0x40] sm:$0xff]   ;;  %v3388_v2 = vld [vmem:[#allocation6 + $0x48] sm:$0xff]   ;;  %s2924_s26 = sshll.u32 %s3999_s19, 5  ;;  %s4960_s27 = sld [smem:[#allocation29_spill]] }
 0x130   : > { %v3387_v1 = vld [vmem:[#allocation6] sm:$0xff]   ;;  %3142 = vmatprep.subr.bf16.mxu0 %v3386_v0  ;;  %v3389_v3 = vld [vmem:[#allocation6 + $0x8] sm:$0xff]   ;;  %v3390_v4 = vld [vmem:[#allocation6 + $0x50] sm:$0xff]   ;;  %p528_p3 = scmp.lt.s32.totalorder %s2924_s26, 255 }
 0x131   : > { %3143 = vmatpush3.bf16.msra.mxu0 %v3387_v1  ;;  %v3391_v5 = vld [vmem:[#allocation6 + $0x10] sm:$0xff]   ;;  %v3392_v6 = vld [vmem:[#allocation6 + $0x58] sm:$0xff]   ;;  %v3394_v8 = vld [vmem:[#allocation6 + $0x60] sm:$0xff]  }
 0x132   : > { %3144 = vmatprep.subr.bf16.mxu0 %v3388_v2  ;;  %v3393_v7 = vld [vmem:[#allocation6 + $0x18] sm:$0xff]   ;;  %v3395_v9 = vld [vmem:[#allocation6 + $0x20] sm:$0xff]   ;;  %v3396_v10 = vld [vmem:[#allocation6 + $0x68] sm:$0xff]   ;;  %s4966_s26 = smov (!%p528_p3, %s2924_s26), 255 }
 0x133   : > { %v536_v11 = vld [vmem:[%s4304_s3 + $0x8] sm:$0xff]  ;;  %v538_v12 = vld [vmem:[%s4304_s3 + $0x18] sm:$0xff]  ;;  %v3398_v15 = vld [vmem:[#allocation6 + $0x70] sm:$0xff]   ;;  %s3077_s18 = sshll.u32 %s4966_s26, 4 }
 0x134   : > { %v600_v13 = vpack.c.bf16 %v538_v12, %v536_v11  ;;  %v3397_v14 = vld [vmem:[#allocation6 + $0x28] sm:$0xff]   ;;  %v3399_v16 = vld [vmem:[#allocation6 + $0x30] sm:$0xff]   ;;  %v3400_v17 = vld [vmem:[#allocation6 + $0x78] sm:$0xff]  }
 0x135   : > { %3145 = vmatpush3.bf16.msra.mxu0 %v3389_v3  ;;  %v3401_v18 = vld [vmem:[#allocation6 + $0x38] sm:$0xff]   ;;  %v535_v19 = vld [vmem:[%s4304_s3] sm:$0xff]  ;;  %v537_v20 = vld [vmem:[%s4304_s3 + $0x10] sm:$0xff]  ;;  %s4470_s30 = scalar_lea.vmem %s4960_s27, %s3077_s18 }
 0x136   : > { %3146 = vmatprep.subr.bf16.mxu0 %v3390_v4  ;;  %798 = vmatprep.mubr.bf16.mxu0 %v600_v13  ;;  %v540_v21 = vld [vmem:[%s4304_s3 + $0x28] sm:$0xff]  ;;  %v542_v22 = vld [vmem:[%s4304_s3 + $0x38] sm:$0xff]  ;;  %v599_v23 = vpack.c.bf16 %v537_v20, %v535_v19  ;;  %v539_v25 = vld [vmem:[%s4304_s3 + $0x20] sm:$0xff] }
 0x137   : > { %v602_v24 = vpack.c.bf16 %v542_v22, %v540_v21  ;;  %v541_v26 = vld [vmem:[%s4304_s3 + $0x30] sm:$0xff]  ;;  %v544_v27 = vld [vmem:[%s4304_s3 + $0x48] sm:$0xff]  ;;  %v546_v28 = vld [vmem:[%s4304_s3 + $0x58] sm:$0xff] }
 0x138   : > { %v601_v29 = vpack.c.bf16 %v541_v26, %v539_v25  ;;  %v3402_v30 = vld [vmem:[#allocation9 + $0x4] ss:$8 sps:$4 sm:$0xff]   ;;  %v3404_v31 = vld [vmem:[#allocation9] ss:$8 sps:$4 sm:$0xff]   ;;  %v604_v32 = vpack.c.bf16 %v546_v28, %v544_v27  ;;  %v3405_v33 = vld [vmem:[#allocation9 + $0x14] ss:$8 sps:$4 sm:$0xff]  }
 0x139   : > { %3147 = vmatpush3.bf16.msra.mxu0 %v3391_v5  ;;  %1083 = vmatprep.subr.bf16.mxu1 %v3402_v30  ;;  %v543_v34 = vld [vmem:[%s4304_s3 + $0x40] sm:$0xff]  ;;  %v545_v35 = vld [vmem:[%s4304_s3 + $0x50] sm:$0xff]  ;;  %v548_v37 = vld [vmem:[%s4304_s3 + $0x68] sm:$0xff] }
 0x13a   : > { %3148 = vmatprep.subr.bf16.mxu0 %v3392_v6  ;;  %1084 = vmatpush1.bf16.msra.mxu1 %v3404_v31  ;;  %v3407_v36 = vld [vmem:[#allocation9 + $0x10] ss:$8 sps:$4 sm:$0xff]   ;;  %v3408_v38 = vld [vmem:[#allocation9 + $0x24] ss:$8 sps:$4 sm:$0xff]   ;;  %v3410_v40 = vld [vmem:[#allocation9 + $0x20] ss:$8 sps:$4 sm:$0xff]   ;;  %v603_v42 = vpack.c.bf16 %v545_v35, %v543_v34 }
 0x13b   : > { %1085 = vmatprep.subr.bf16.mxu1 %v3405_v33  ;;  %v550_v39 = vld [vmem:[%s4304_s3 + $0x78] sm:$0xff]  ;;  %v3414_v45 = vld [vmem:[#allocation9 + $0x44] ss:$8 sps:$4 sm:$0xff]   ;;  %v3416_v50 = vld [vmem:[#allocation9 + $0x40] ss:$8 sps:$4 sm:$0xff]  }
 0x13c   : > { %v3411_v41 = vld [vmem:[#allocation9 + $0x34] ss:$8 sps:$4 sm:$0xff]   ;;  %v606_v43 = vpack.c.bf16 %v550_v39, %v548_v37  ;;  %v3413_v44 = vld [vmem:[#allocation9 + $0x30] ss:$8 sps:$4 sm:$0xff]   ;;  %v552_v48 = vld [vmem:[%s4304_s3 + $0x88] sm:$0xff] }
 0x13d   : > { %3149 = vmatpush3.bf16.msra.mxu0 %v3393_v7  ;;  %v547_v46 = vld [vmem:[%s4304_s3 + $0x60] sm:$0xff]  ;;  %v549_v47 = vld [vmem:[%s4304_s3 + $0x70] sm:$0xff]  ;;  %v554_v49 = vld [vmem:[%s4304_s3 + $0x98] sm:$0xff] }
 0x13e   : > { %3150 = vmatprep.subr.bf16.mxu0 %v3394_v8  ;;  %1086 = vmatpush1.bf16.msra.mxu1 %v3407_v36  ;;  %v605_v51 = vpack.c.bf16 %v549_v47, %v547_v46  ;;  %v608_v52 = vpack.c.bf16 %v554_v49, %v552_v48  ;;  %v551_v53 = vld [vmem:[%s4304_s3 + $0x80] sm:$0xff]  ;;  %v553_v54 = vld [vmem:[%s4304_s3 + $0x90] sm:$0xff]  ;;  %v556_v55 = vld [vmem:[%s4304_s3 + $0xa8] sm:$0xff]  ;;  %v3922_v49 = vmov 0  }
 0x13f   : > { %1087 = vmatprep.subr.bf16.mxu1 %v3408_v38  ;;  %v558_v56 = vld [vmem:[%s4304_s3 + $0xb8] sm:$0xff]  ;;  %v607_v57 = vpack.c.bf16 %v553_v54, %v551_v53  ;;  %v555_v59 = vld [vmem:[%s4304_s3 + $0xa0] sm:$0xff]  ;;  %v557_v60 = vld [vmem:[%s4304_s3 + $0xb0] sm:$0xff]  ;;  %1115 = vmatprep.mubr.bf16.mxu1 %v3922_v49 }
 0x140   : > { %v610_v58 = vpack.c.bf16 %v558_v56, %v556_v55  ;;  %v560_v61 = vld [vmem:[%s4304_s3 + $0xc8] sm:$0xff]  ;;  %v562_v62 = vld [vmem:[%s4304_s3 + $0xd8] sm:$0xff]  ;;  %v609_v63 = vpack.c.bf16 %v557_v60, %v555_v59  ;;  %v559_v1 = vld [vmem:[%s4304_s3 + $0xc0] sm:$0xff] }
 0x141   : > { %3151 = vmatpush3.bf16.msra.mxu0 %v3395_v9  ;;  %v612_v0 = vpack.c.bf16 %v562_v62, %v560_v61  ;;  %v561_v2 = vld [vmem:[%s4304_s3 + $0xd0] sm:$0xff]  ;;  %v564_v3 = vld [vmem:[%s4304_s3 + $0xe8] sm:$0xff]  ;;  %v566_v4 = vld [vmem:[%s4304_s3 + $0xf8] sm:$0xff] }
 0x142   : > { %3152 = vmatprep.subr.bf16.mxu0 %v3396_v10  ;;  %1088 = vmatpush1.bf16.msra.mxu1 %v3410_v40  ;;  %v611_v5 = vpack.c.bf16 %v561_v2, %v559_v1  ;;  %v614_v6 = vpack.c.bf16 %v566_v4, %v564_v3  ;;  %v563_v7 = vld [vmem:[%s4304_s3 + $0xe0] sm:$0xff]  ;;  %v565_v8 = vld [vmem:[%s4304_s3 + $0xf0] sm:$0xff]  ;;  %v568_v9 = vld [vmem:[%s4304_s3 + $0x108] sm:$0xff] }
 0x143   : > { %1089 = vmatprep.subr.bf16.mxu1 %v3411_v41  ;;  %v570_v10 = vld [vmem:[%s4304_s3 + $0x118] sm:$0xff]  ;;  %v613_v11 = vpack.c.bf16 %v565_v8, %v563_v7  ;;  %v567_v13 = vld [vmem:[%s4304_s3 + $0x100] sm:$0xff]  ;;  %v573_v20 = vld [vmem:[%s4304_s3 + $0x130] sm:$0xff] }
 0x144   : > { %v616_v12 = vpack.c.bf16 %v570_v10, %v568_v9  ;;  %v571_v19 = vld [vmem:[%s4304_s3 + $0x120] sm:$0xff]  ;;  %v576_v21 = vld [vmem:[%s4304_s3 + $0x148] sm:$0xff]  ;;  %v578_v22 = vld [vmem:[%s4304_s3 + $0x158] sm:$0xff] }
 0x145   : > { %3153 = vmatpush3.bf16.msra.mxu0 %v3397_v14  ;;  %v569_v14 = vld [vmem:[%s4304_s3 + $0x110] sm:$0xff]  ;;  %v575_v25 = vld [vmem:[%s4304_s3 + $0x140] sm:$0xff]  ;;  %v580_v27 = vld [vmem:[%s4304_s3 + $0x168] sm:$0xff] }
 0x146   : > { %3154 = vmatprep.subr.bf16.mxu0 %v3398_v15  ;;  %1090 = vmatpush1.bf16.msra.mxu1 %v3413_v44  ;;  %v572_v15 = vld [vmem:[%s4304_s3 + $0x128] sm:$0xff]  ;;  %v577_v26 = vld [vmem:[%s4304_s3 + $0x150] sm:$0xff]  ;;  %v582_v28 = vld [vmem:[%s4304_s3 + $0x178] sm:$0xff] }
 0x147   : > { %1091 = vmatprep.subr.bf16.mxu1 %v3414_v45  ;;  %v622_v30 = vpack.c.bf16 %v582_v28, %v580_v27  ;;  %v579_v31 = vld [vmem:[%s4304_s3 + $0x160] sm:$0xff]  ;;  %v584_v34 = vld [vmem:[%s4304_s3 + $0x188] sm:$0xff]  ;;  %v586_v35 = vld [vmem:[%s4304_s3 + $0x198] sm:$0xff] }
 0x148   : > { %v3417_v33 = vld [vmem:[#allocation9 + $0x54] ss:$8 sps:$4 sm:$0xff]   ;;  %v3419_v36 = vld [vmem:[#allocation9 + $0x50] ss:$8 sps:$4 sm:$0xff]   ;;  %v624_v38 = vpack.c.bf16 %v586_v35, %v584_v34  ;;  %v3420_v39 = vld [vmem:[#allocation9 + $0x64] ss:$8 sps:$4 sm:$0xff]  }
 0x149   : > { %3155 = vmatpush3.bf16.msra.mxu0 %v3399_v16  ;;  %v574_v16 = vld [vmem:[%s4304_s3 + $0x138] sm:$0xff]  ;;  %v3422_v40 = vld [vmem:[#allocation9 + $0x60] ss:$8 sps:$4 sm:$0xff]   ;;  %v4403_v4 = vld [vmem:[#allocation7] ss:$0 sm:$0xff] }
 0x14a   : > { %3156 = vmatprep.subr.bf16.mxu0 %v3400_v17  ;;  %1092 = vmatpush1.bf16.msra.mxu1 %v3416_v50  ;;  %v615_v17 = vpack.c.bf16 %v569_v14, %v567_v13  ;;  %v583_v41 = vld [vmem:[%s4304_s3 + $0x180] sm:$0xff]  ;;  %v588_v44 = vld [vmem:[%s4304_s3 + $0x1a8] sm:$0xff]  ;;  %v590_v45 = vld [vmem:[%s4304_s3 + $0x1b8] sm:$0xff] }
 0x14b   : > { %1093 = vmatprep.subr.bf16.mxu1 %v3417_v33  ;;  %v3425_v46 = vld [vmem:[#allocation9 + $0x70] ss:$8 sps:$4 sm:$0xff]   ;;  %v626_v48 = vpack.c.bf16 %v590_v45, %v588_v44  ;;  %v587_v50 = vld [vmem:[%s4304_s3 + $0x1a0] sm:$0xff] }
 0x14c   : > { %v594_v53 = vld [vmem:[%s4304_s3 + $0x1d8] sm:$0xff]  ;;  %v591_v56 = vld [vmem:[%s4304_s3 + $0x1c0] sm:$0xff]  ;;  %v3428_v2 = vld [vmem:[#allocation12 + $0x4] ss:$8 sps:$4 sm:$0xff]  }
 0x14d   : > { %3157 = vmatpush3.bf16.msra.mxu0 %v3401_v18  ;;  %v618_v18 = vpack.c.bf16 %v574_v16, %v572_v15  ;;  %v598_v59 = vld [vmem:[%s4304_s3 + $0x1f8] sm:$0xff]  ;;  %v595_v62 = vld [vmem:[%s4304_s3 + $0x1e0] sm:$0xff]  ;;  %v3434_v13 = vld [vmem:[#allocation12 + $0x24] ss:$8 sps:$4 sm:$0xff]  }
 0x14e   : > { %1094 = vmatpush1.bf16.msra.mxu1 %v3419_v36  ;;  %v3426_v1 = vld [vmem:[#allocation12] ss:$8 sps:$4 sm:$0xff]   ;;  %1592 = vmatprep.subr.bf16.mxu0 %v3428_v2  ;;  %v3440_v28 = vld [vmem:[#allocation12 + $0x44] ss:$8 sps:$4 sm:$0xff]   ;;  %v3443_v34 = vld [vmem:[#allocation12 + $0x54] ss:$8 sps:$4 sm:$0xff]  }
 0x14f   : > { %1095 = vmatprep.subr.bf16.mxu1 %v3420_v39  ;;  %v3432_v15 = vld [vmem:[#allocation12 + $0x20] ss:$8 sps:$4 sm:$0xff]  }
 0x150   : > { %799 = vmatmul.mubr.bf16.vlgmr.msra.gmra.mrb[0].mxu0 %v599_v23  ;;  %v617_v23 = vpack.c.bf16 %v573_v20, %v571_v19  ;;  %v3437_v19 = vld [vmem:[#allocation12 + $0x34] ss:$8 sps:$4 sm:$0xff]   ;;  %v3444_v45 = vld [vmem:[#allocation12 + $0x60] ss:$8 sps:$4 sm:$0xff]  }
 0x151   : > { %806 = vmatprep.mubr.bf16.mxu0 %v602_v24  ;;  %v620_v24 = vpack.c.bf16 %v578_v22, %v576_v21  ;;  %1593 = vmatpush1.bf16.msra.mxu0 %v3426_v1 }
 0x152   : > { %1096 = vmatpush1.bf16.msra.mxu1 %v3422_v40  ;;  %v3441_v40 = vld [vmem:[#allocation12 + $0x50] ss:$8 sps:$4 sm:$0xff]  }
 0x158   : > { %807 = vmatmul.mubr.bf16.gmra.mrb[4].mxu0 %v601_v29  ;;  %v619_v29 = vpack.c.bf16 %v577_v26, %v575_v25  ;;  %v3435_v25 = vld [vmem:[#allocation12 + $0x30] ss:$8 sps:$4 sm:$0xff]  }
 0x159   : > { %814 = vmatprep.mubr.bf16.mxu0 %v604_v32  ;;  %v581_v32 = vld [vmem:[%s4304_s3 + $0x170] sm:$0xff] }
 0x15a   : > { %v621_v37 = vpack.c.bf16 %v581_v32, %v579_v31 }
 0x160   : > { %815 = vmatmul.mubr.bf16.gmra.mrb[8].mxu0 %v603_v42  ;;  %v585_v42 = vld [vmem:[%s4304_s3 + $0x190] sm:$0xff] }
 0x161   : > { %822 = vmatprep.mubr.bf16.mxu0 %v606_v43  ;;  %v3423_v43 = vld [vmem:[#allocation9 + $0x74] ss:$8 sps:$4 sm:$0xff]   ;;  %v623_v47 = vpack.c.bf16 %v585_v42, %v583_v41 }
 0x162   : > { %1097 = vmatprep.subr.bf16.mxu1 %v3423_v43  ;;  %v3446_v43 = vld [vmem:[#allocation12 + $0x64] ss:$8 sps:$4 sm:$0xff]  }
 0x163   : > { %1098 = vmatpush1.bf16.msra.mxu1 %v3425_v46 }
 0x168   : > { %823 = vmatmul.mubr.bf16.gmra.mrb[12].mxu0 %v605_v51  ;;  %v589_v51 = vld [vmem:[%s4304_s3 + $0x1b0] sm:$0xff] }
 0x169   : > { %830 = vmatprep.mubr.bf16.mxu0 %v608_v52  ;;  %v592_v52 = vld [vmem:[%s4304_s3 + $0x1c8] sm:$0xff]  ;;  %v625_v54 = vpack.c.bf16 %v589_v51, %v587_v50 }
 0x16a   : > { %v628_v55 = vpack.c.bf16 %v594_v53, %v592_v52 }
 0x170   : > { %831 = vmatmul.mubr.bf16.gmra.mrb[16].mxu0 %v607_v57  ;;  %v593_v57 = vld [vmem:[%s4304_s3 + $0x1d0] sm:$0xff] }
 0x171   : > { %838 = vmatprep.mubr.bf16.mxu0 %v610_v58  ;;  %v596_v58 = vld [vmem:[%s4304_s3 + $0x1e8] sm:$0xff]  ;;  %v627_v60 = vpack.c.bf16 %v593_v57, %v591_v56 }
 0x172   : > { %v630_v61 = vpack.c.bf16 %v598_v59, %v596_v58 }
 0x178   : > { %839 = vmatmul.mubr.bf16.gmra.mrb[20].mxu0 %v609_v63  ;;  %v597_v63 = vld [vmem:[%s4304_s3 + $0x1f0] sm:$0xff] }
 0x179   : > { %846 = vmatprep.mubr.bf16.mxu0 %v612_v0  ;;  %v629_v0 = vpack.c.bf16 %v597_v63, %v595_v62 }
 0x180   : > { %847 = vmatmul.mubr.bf16.gmra.mrb[24].mxu0 %v611_v5 }
 0x181   : > { %854 = vmatprep.mubr.bf16.mxu0 %v614_v6 }
 0x188   : > { %855 = vmatmul.mubr.bf16.gmra.mrb[28].mxu0 %v613_v11  ;;  %v3429_v11 = vld [vmem:[#allocation12 + $0x10] ss:$8 sps:$4 sm:$0xff]  }
 0x189   : > { %862 = vmatprep.mubr.bf16.mxu0 %v616_v12  ;;  %v3431_v12 = vld [vmem:[#allocation12 + $0x14] ss:$8 sps:$4 sm:$0xff]  }
 0x18a   : > { %1594 = vmatprep.subr.bf16.mxu0 %v3431_v12 }
 0x18b   : > { %1595 = vmatpush1.bf16.msra.mxu0 %v3429_v11 }
 0x18c   : > { %1596 = vmatprep.subr.bf16.mxu0 %v3434_v13 }
 0x18f   : > { %1597 = vmatpush1.bf16.msra.mxu0 %v3432_v15 }
 0x190   : > { %863 = vmatmul.mubr.bf16.gmra.mrb[32].mxu0 %v615_v17  ;;  %1598 = vmatprep.subr.bf16.mxu0 %v3437_v19 }
 0x191   : > { %870 = vmatprep.mubr.bf16.mxu0 %v618_v18 }
 0x193   : > { %1599 = vmatpush1.bf16.msra.mxu0 %v3435_v25 }
 0x194   : > { %1600 = vmatprep.subr.bf16.mxu0 %v3440_v28 }
 0x198   : > { %871 = vmatmul.mubr.bf16.gmra.mrb[36].mxu0 %v617_v23 }
 0x199   : > { %878 = vmatprep.mubr.bf16.mxu0 %v620_v24 }
 0x1a0   : > { %879 = vmatmul.mubr.bf16.gmra.mrb[40].mxu0 %v619_v29 }
 0x1a1   : > { %886 = vmatprep.mubr.bf16.mxu0 %v622_v30  ;;  %v3438_v30 = vld [vmem:[#allocation12 + $0x40] ss:$8 sps:$4 sm:$0xff]  }
 0x1a2   : > { %1601 = vmatpush1.bf16.msra.mxu0 %v3438_v30 }
 0x1a3   : > { %1602 = vmatprep.subr.bf16.mxu0 %v3443_v34 }
 0x1a6   : > { %1603 = vmatpush1.bf16.msra.mxu0 %v3441_v40 }
 0x1a7   : > { %1604 = vmatprep.subr.bf16.mxu0 %v3446_v43 }
 0x1a8   : > { %887 = vmatmul.mubr.bf16.gmra.mrb[44].mxu0 %v621_v37 }
 0x1a9   : > { %894 = vmatprep.mubr.bf16.mxu0 %v624_v38 }
 0x1aa   : > { %1605 = vmatpush1.bf16.msra.mxu0 %v3444_v45 }
 0x1b0   : > { %895 = vmatmul.mubr.bf16.gmra.mrb[48].mxu0 %v623_v47 }
 0x1b1   : > { %902 = vmatprep.mubr.bf16.mxu0 %v626_v48 }
 0x1b8   : > { %903 = vmatmul.mubr.bf16.gmra.mrb[52].mxu0 %v625_v54 }
 0x1b9   : > { %910 = vmatprep.mubr.bf16.mxu0 %v628_v55 }
 0x1c0   : > { %911 = vmatmul.mubr.bf16.gmra.mrb[56].mxu0 %v627_v60 }
 0x1c1   : > { %918 = vmatprep.mubr.bf16.mxu0 %v630_v61 }
 0x1c8   : > { %919 = vmatmul.mubr.bf16.gmra.mrb[60].mxu0 %v629_v0 }
 0x1c9   : > { %1624 = vmatprep.mubr.bf16.mxu0 %v3922_v49 }
 0x223   : > { %v3158_v3 = vpop.f32.mrb[0].mxu0 }
 0x224   : > { %v3159_v5 = vpop.f32.mrb[1].mxu0 }
 0x225   : > { %v3160_v6 = vadd.f32 %v3159_v5, %v3158_v3  ;;  %v3161_v7 = vpop.f32.mrb[2].mxu0 }
 0x226   : > { %v3162_v8 = vpop.f32.mrb[3].mxu0 }
 0x227   : > { %v801_v9 = vadd.f32 %v3160_v6, %v4403_v4  ;;  %v3163_v10 = vadd.f32 %v3162_v8, %v3161_v7 }
 0x229   : > { %v804_v14 = vadd.f32 %v3163_v10, %v4403_v4  ;;  %v927_v16 = vmax.f32 %v801_v9, 0.0 }
 0x22b   : > { %v928_v17 = vmax.f32 %v804_v14, 0.0  ;;  %v3164_v18 = vpop.f32.mrb[4].mxu0 }
 0x22c   : > { %v3165_v20 = vpop.f32.mrb[5].mxu0 }
 0x22d   : > { %v3166_v21 = vadd.f32 %v3165_v20, %v3164_v18  ;;  %v3167_v22 = vpop.f32.mrb[6].mxu0  ;;  %v959_v23 = vpack.c.bf16 %v928_v17, %v927_v16 }
 0x22e   : > { %v3168_v24 = vpop.f32.mrb[7].mxu0 }
 0x22f   : > { %v809_v26 = vadd.f32 %v3166_v21, %v4403_v4  ;;  %v3169_v27 = vadd.f32 %v3168_v24, %v3167_v22  ;;  %1116 = vmatmul.mubr.bf16.vlgmr.msra.gmra.mrb[0].mxu1 %v959_v23 }
 0x230   : > { %1125 = vmatprep.mubr.bf16.mxu1 %v3922_v49 }
 0x231   : > { %v812_v29 = vadd.f32 %v3169_v27, %v4403_v4  ;;  %v929_v31 = vmax.f32 %v809_v26, 0.0 }
 0x233   : > { %v930_v32 = vmax.f32 %v812_v29, 0.0  ;;  %v3170_v33 = vpop.f32.mrb[8].mxu0 }
 0x234   : > { %v3171_v35 = vpop.f32.mrb[9].mxu0 }
 0x235   : > { %v3172_v36 = vadd.f32 %v3171_v35, %v3170_v33  ;;  %v3173_v37 = vpop.f32.mrb[10].mxu0  ;;  %v960_v38 = vpack.c.bf16 %v930_v32, %v929_v31 }
 0x236   : > { %v3174_v39 = vpop.f32.mrb[11].mxu0 }
 0x237   : > { %v817_v41 = vadd.f32 %v3172_v36, %v4403_v4  ;;  %v3175_v42 = vadd.f32 %v3174_v39, %v3173_v37  ;;  %1126 = vmatmul.mubr.bf16.gmra.mrb[4].mxu1 %v960_v38 }
 0x238   : > { %1135 = vmatprep.mubr.bf16.mxu1 %v3922_v49 }
 0x239   : > { %v820_v44 = vadd.f32 %v3175_v42, %v4403_v4  ;;  %v931_v46 = vmax.f32 %v817_v41, 0.0 }
 0x23b   : > { %v932_v47 = vmax.f32 %v820_v44, 0.0  ;;  %v3176_v48 = vpop.f32.mrb[12].mxu0 }
 0x23c   : > { %v3177_v50 = vpop.f32.mrb[13].mxu0 }
 0x23d   : > { %v3178_v51 = vadd.f32 %v3177_v50, %v3176_v48  ;;  %v3179_v52 = vpop.f32.mrb[14].mxu0  ;;  %v961_v53 = vpack.c.bf16 %v932_v47, %v931_v46 }
 0x23e   : > { %v3180_v54 = vpop.f32.mrb[15].mxu0 }
 0x23f   : > { %v825_v55 = vadd.f32 %v3178_v51, %v4403_v4  ;;  %v3181_v56 = vadd.f32 %v3180_v54, %v3179_v52  ;;  %1136 = vmatmul.mubr.bf16.gmra.mrb[8].mxu1 %v961_v53 }
 0x240   : > { %1145 = vmatprep.mubr.bf16.mxu1 %v3922_v49 }
 0x241   : > { %v828_v57 = vadd.f32 %v3181_v56, %v4403_v4  ;;  %v933_v58 = vmax.f32 %v825_v55, 0.0 }
 0x243   : > { %v934_v59 = vmax.f32 %v828_v57, 0.0  ;;  %v3182_v60 = vpop.f32.mrb[16].mxu0 }
 0x244   : > { %v3183_v61 = vpop.f32.mrb[17].mxu0 }
 0x245   : > { %v3184_v62 = vadd.f32 %v3183_v61, %v3182_v60  ;;  %v3185_v63 = vpop.f32.mrb[18].mxu0  ;;  %v962_v0 = vpack.c.bf16 %v934_v59, %v933_v58 }
 0x246   : > { %v3186_v1 = vpop.f32.mrb[19].mxu0 }
 0x247   : > { %v833_v2 = vadd.f32 %v3184_v62, %v4403_v4  ;;  %v3187_v3 = vadd.f32 %v3186_v1, %v3185_v63  ;;  %1146 = vmatmul.mubr.bf16.gmra.mrb[12].mxu1 %v962_v0 }
 0x248   : > { %1155 = vmatprep.mubr.bf16.mxu1 %v3922_v49 }
 0x249   : > { %v836_v5 = vadd.f32 %v3187_v3, %v4403_v4  ;;  %v935_v6 = vmax.f32 %v833_v2, 0.0 }
 0x24b   : > { %v936_v7 = vmax.f32 %v836_v5, 0.0  ;;  %v3188_v8 = vpop.f32.mrb[20].mxu0 }
 0x24c   : > { %v3189_v9 = vpop.f32.mrb[21].mxu0 }
 0x24d   : > { %v3190_v10 = vadd.f32 %v3189_v9, %v3188_v8  ;;  %v3191_v11 = vpop.f32.mrb[22].mxu0  ;;  %v963_v12 = vpack.c.bf16 %v936_v7, %v935_v6 }
 0x24e   : > { %v3192_v13 = vpop.f32.mrb[23].mxu0 }
 0x24f   : > { %v841_v14 = vadd.f32 %v3190_v10, %v4403_v4  ;;  %v3193_v15 = vadd.f32 %v3192_v13, %v3191_v11  ;;  %1156 = vmatmul.mubr.bf16.gmra.mrb[16].mxu1 %v963_v12 }
 0x250   : > { %1165 = vmatprep.mubr.bf16.mxu1 %v3922_v49 }
 0x251   : > { %v844_v16 = vadd.f32 %v3193_v15, %v4403_v4  ;;  %v937_v17 = vmax.f32 %v841_v14, 0.0 }
 0x253   : > { %v938_v18 = vmax.f32 %v844_v16, 0.0  ;;  %v3194_v19 = vpop.f32.mrb[24].mxu0 }
 0x254   : > { %v3195_v20 = vpop.f32.mrb[25].mxu0 }
 0x255   : > { %v3196_v21 = vadd.f32 %v3195_v20, %v3194_v19  ;;  %v3197_v22 = vpop.f32.mrb[26].mxu0  ;;  %v964_v23 = vpack.c.bf16 %v938_v18, %v937_v17 }
 0x256   : > { %v3198_v24 = vpop.f32.mrb[27].mxu0 }
 0x257   : > { %v849_v25 = vadd.f32 %v3196_v21, %v4403_v4  ;;  %v3199_v26 = vadd.f32 %v3198_v24, %v3197_v22  ;;  %1166 = vmatmul.mubr.bf16.gmra.mrb[20].mxu1 %v964_v23 }
 0x258   : > { %1175 = vmatprep.mubr.bf16.mxu1 %v3922_v49 }
 0x259   : > { %v852_v27 = vadd.f32 %v3199_v26, %v4403_v4  ;;  %v939_v28 = vmax.f32 %v849_v25, 0.0 }
 0x25b   : > { %v940_v29 = vmax.f32 %v852_v27, 0.0  ;;  %v3200_v30 = vpop.f32.mrb[28].mxu0 }
 0x25c   : > { %v3201_v31 = vpop.f32.mrb[29].mxu0 }
 0x25d   : > { %v3202_v32 = vadd.f32 %v3201_v31, %v3200_v30  ;;  %v3203_v33 = vpop.f32.mrb[30].mxu0  ;;  %v965_v34 = vpack.c.bf16 %v940_v29, %v939_v28 }
 0x25e   : > { %v3204_v35 = vpop.f32.mrb[31].mxu0 }
 0x25f   : > { %v857_v36 = vadd.f32 %v3202_v32, %v4403_v4  ;;  %v3205_v37 = vadd.f32 %v3204_v35, %v3203_v33  ;;  %1176 = vmatmul.mubr.bf16.gmra.mrb[24].mxu1 %v965_v34 }
 0x260   : > { %1185 = vmatprep.mubr.bf16.mxu1 %v3922_v49 }
 0x261   : > { %v860_v38 = vadd.f32 %v3205_v37, %v4403_v4  ;;  %v941_v39 = vmax.f32 %v857_v36, 0.0 }
 0x263   : > { %v942_v40 = vmax.f32 %v860_v38, 0.0  ;;  %v3206_v41 = vpop.f32.mrb[32].mxu0 }
 0x264   : > { %v3207_v42 = vpop.f32.mrb[33].mxu0 }
 0x265   : > { %v3208_v43 = vadd.f32 %v3207_v42, %v3206_v41  ;;  %v3209_v44 = vpop.f32.mrb[34].mxu0  ;;  %v966_v45 = vpack.c.bf16 %v942_v40, %v941_v39 }
 0x266   : > { %v3210_v46 = vpop.f32.mrb[35].mxu0 }
 0x267   : > { %v865_v47 = vadd.f32 %v3208_v43, %v4403_v4  ;;  %v3211_v48 = vadd.f32 %v3210_v46, %v3209_v44  ;;  %1186 = vmatmul.mubr.bf16.gmra.mrb[28].mxu1 %v966_v45 }
 0x268   : > { %1195 = vmatprep.mubr.bf16.mxu1 %v3922_v49 }
 0x269   : > { %v868_v50 = vadd.f32 %v3211_v48, %v4403_v4  ;;  %v943_v51 = vmax.f32 %v865_v47, 0.0 }
 0x26b   : > { %v944_v52 = vmax.f32 %v868_v50, 0.0  ;;  %v3212_v53 = vpop.f32.mrb[36].mxu0 }
 0x26c   : > { %v3213_v54 = vpop.f32.mrb[37].mxu0 }
 0x26d   : > { %v3214_v55 = vadd.f32 %v3213_v54, %v3212_v53  ;;  %v3215_v56 = vpop.f32.mrb[38].mxu0  ;;  %v967_v57 = vpack.c.bf16 %v944_v52, %v943_v51  ;;  %v3447_v54 = vld [vmem:[#allocation12 + $0x70] ss:$8 sps:$4 sm:$0xff]  }
 0x26e   : > { %v3216_v58 = vpop.f32.mrb[39].mxu0 }
 0x26f   : > { %v873_v59 = vadd.f32 %v3214_v55, %v4403_v4  ;;  %v3217_v60 = vadd.f32 %v3216_v58, %v3215_v56  ;;  %1196 = vmatmul.mubr.bf16.gmra.mrb[32].mxu1 %v967_v57  ;;  %v3449_v55 = vld [vmem:[#allocation12 + $0x74] ss:$8 sps:$4 sm:$0xff]  }
 0x270   : > { %1205 = vmatprep.mubr.bf16.mxu1 %v3922_v49  ;;  %1606 = vmatprep.subr.bf16.mxu0 %v3449_v55 }
 0x271   : > { %v876_v61 = vadd.f32 %v3217_v60, %v4403_v4  ;;  %v945_v62 = vmax.f32 %v873_v59, 0.0  ;;  %1607 = vmatpush1.bf16.msra.mxu0 %v3447_v54 }
 0x273   : > { %v946_v63 = vmax.f32 %v876_v61, 0.0  ;;  %v3218_v0 = vpop.f32.mrb[40].mxu0 }
 0x274   : > { %v3219_v1 = vpop.f32.mrb[41].mxu0 }
 0x275   : > { %v3220_v2 = vadd.f32 %v3219_v1, %v3218_v0  ;;  %v3221_v3 = vpop.f32.mrb[42].mxu0  ;;  %v968_v5 = vpack.c.bf16 %v946_v63, %v945_v62 }
 0x276   : > { %v3222_v6 = vpop.f32.mrb[43].mxu0 }
 0x277   : > { %v881_v7 = vadd.f32 %v3220_v2, %v4403_v4  ;;  %v3223_v8 = vadd.f32 %v3222_v6, %v3221_v3  ;;  %1206 = vmatmul.mubr.bf16.gmra.mrb[36].mxu1 %v968_v5 }
 0x278   : > { %1215 = vmatprep.mubr.bf16.mxu1 %v3922_v49 }
 0x279   : > { %v884_v9 = vadd.f32 %v3223_v8, %v4403_v4  ;;  %v947_v10 = vmax.f32 %v881_v7, 0.0  ;;  %v993_v8 = vlaneseq }
 0x27b   : > { %v948_v11 = vmax.f32 %v884_v9, 0.0  ;;  %v3224_v12 = vpop.f32.mrb[44].mxu0  ;;  %v994_v9 = vshrl.u32 %v993_v8, 7 }
 0x27c   : > { %v3225_v13 = vpop.f32.mrb[45].mxu0 }
 0x27d   : > { %v3226_v14 = vadd.f32 %v3225_v13, %v3224_v12  ;;  %v3227_v15 = vpop.f32.mrb[46].mxu0  ;;  %v969_v16 = vpack.c.bf16 %v948_v11, %v947_v10  ;;  %v991_v10 = vld [vmem:[#allocation10] sm:$0x3]  ;;  %v4453_v11 = vsub.s32 0, %v994_v9  ;;  %v4455_v12 = vsub.s32 1, %v994_v9 }
 0x27e   : > { %v3228_v17 = vpop.f32.mrb[47].mxu0  ;;  %v3450_v13 = vld [vmem:[#allocation15] ss:$8 sps:$4 sm:$0xff]  }
 0x27f   : > { %v889_v18 = vadd.f32 %v3226_v14, %v4403_v4  ;;  %v3229_v19 = vadd.f32 %v3228_v17, %v3227_v15  ;;  %1216 = vmatmul.mubr.bf16.gmra.mrb[40].mxu1 %v969_v16  ;;  %v3452_v14 = vld [vmem:[#allocation15 + $0x4] ss:$8 sps:$4 sm:$0xff]   ;;  %v4458_v15 = vrot.slane %v991_v10, %v4453_v11 }
 0x280   : > { %1225 = vmatprep.mubr.bf16.mxu1 %v3922_v49  ;;  %2085 = vmatprep.subr.bf16.mxu1 %v3452_v14 }
 0x281   : > { %v892_v20 = vadd.f32 %v3229_v19, %v4403_v4  ;;  %v949_v21 = vmax.f32 %v889_v18, 0.0  ;;  %2086 = vmatpush1.bf16.msra.mxu1 %v3450_v13  ;;  %v3465_v13 = vld [vmem:[#allocation15 + $0x50] ss:$8 sps:$4 sm:$0xff]  }
 0x283   : > { %v950_v22 = vmax.f32 %v892_v20, 0.0  ;;  %v3230_v23 = vpop.f32.mrb[48].mxu0 }
 0x284   : > { %v3231_v24 = vpop.f32.mrb[49].mxu0 }
 0x285   : > { %v3232_v25 = vadd.f32 %v3231_v24, %v3230_v23  ;;  %v3233_v26 = vpop.f32.mrb[50].mxu0  ;;  %v970_v27 = vpack.c.bf16 %v950_v22, %v949_v21  ;;  %v3453_v21 = vld [vmem:[#allocation15 + $0x10] ss:$8 sps:$4 sm:$0xff]   ;;  %v3455_v22 = vld [vmem:[#allocation15 + $0x14] ss:$8 sps:$4 sm:$0xff]  }
 0x286   : > { %v3234_v28 = vpop.f32.mrb[51].mxu0  ;;  %2087 = vmatprep.subr.bf16.mxu1 %v3455_v22 }
 0x287   : > { %v897_v29 = vadd.f32 %v3232_v25, %v4403_v4  ;;  %v3235_v30 = vadd.f32 %v3234_v28, %v3233_v26  ;;  %1226 = vmatmul.mubr.bf16.gmra.mrb[44].mxu1 %v970_v27  ;;  %v3458_v25 = vld [vmem:[#allocation15 + $0x24] ss:$8 sps:$4 sm:$0xff]  }
 0x288   : > { %1235 = vmatprep.mubr.bf16.mxu1 %v3922_v49  ;;  %2088 = vmatpush1.bf16.msra.mxu1 %v3453_v21 }
 0x289   : > { %v900_v31 = vadd.f32 %v3235_v30, %v4403_v4  ;;  %v951_v32 = vmax.f32 %v897_v29, 0.0  ;;  %v3456_v29 = vld [vmem:[#allocation15 + $0x20] ss:$8 sps:$4 sm:$0xff]   ;;  %2089 = vmatprep.subr.bf16.mxu1 %v3458_v25 }
 0x28b   : > { %v952_v33 = vmax.f32 %v900_v31, 0.0  ;;  %v3236_v34 = vpop.f32.mrb[52].mxu0 }
 0x28c   : > { %v3237_v35 = vpop.f32.mrb[53].mxu0  ;;  %2090 = vmatpush1.bf16.msra.mxu1 %v3456_v29 }
 0x28d   : > { %v3238_v36 = vadd.f32 %v3237_v35, %v3236_v34  ;;  %v3239_v37 = vpop.f32.mrb[54].mxu0  ;;  %v971_v38 = vpack.c.bf16 %v952_v33, %v951_v32 }
 0x28e   : > { %v3240_v39 = vpop.f32.mrb[55].mxu0 }
 0x28f   : > { %v905_v40 = vadd.f32 %v3238_v36, %v4403_v4  ;;  %v3241_v41 = vadd.f32 %v3240_v39, %v3239_v37  ;;  %1236 = vmatmul.mubr.bf16.gmra.mrb[48].mxu1 %v971_v38 }
 0x290   : > { %1245 = vmatprep.mubr.bf16.mxu1 %v3922_v49 }
 0x291   : > { %v908_v42 = vadd.f32 %v3241_v41, %v4403_v4  ;;  %v953_v43 = vmax.f32 %v905_v40, 0.0  ;;  %v3459_v41 = vld [vmem:[#allocation15 + $0x30] ss:$8 sps:$4 sm:$0xff]  }
 0x293   : > { %v954_v44 = vmax.f32 %v908_v42, 0.0  ;;  %v3242_v45 = vpop.f32.mrb[56].mxu0  ;;  %v3461_v42 = vld [vmem:[#allocation15 + $0x34] ss:$8 sps:$4 sm:$0xff]  }
 0x294   : > { %v3243_v46 = vpop.f32.mrb[57].mxu0  ;;  %2091 = vmatprep.subr.bf16.mxu1 %v3461_v42 }
 0x295   : > { %v3244_v47 = vadd.f32 %v3243_v46, %v3242_v45  ;;  %v3245_v48 = vpop.f32.mrb[58].mxu0  ;;  %v972_v50 = vpack.c.bf16 %v954_v44, %v953_v43  ;;  %2092 = vmatpush1.bf16.msra.mxu1 %v3459_v41 }
 0x296   : > { %v3246_v51 = vpop.f32.mrb[59].mxu0 }
 0x297   : > { %v913_v52 = vadd.f32 %v3244_v47, %v4403_v4  ;;  %v3247_v53 = vadd.f32 %v3246_v51, %v3245_v48  ;;  %1246 = vmatmul.mubr.bf16.gmra.mrb[52].mxu1 %v972_v50  ;;  %v1276_v50 = vld [vmem:[%s4311_s22] sm:$0xff] }
 0x298   : > { %1255 = vmatprep.mubr.bf16.mxu1 %v3922_v49 }
 0x299   : > { %v916_v56 = vadd.f32 %v3247_v53, %v4403_v4  ;;  %v955_v57 = vmax.f32 %v913_v52, 0.0 }
 0x29b   : > { %v956_v58 = vmax.f32 %v916_v56, 0.0  ;;  %v3248_v59 = vpop.f32.mrb[60].mxu0  ;;  %v1277_v56 = vld [vmem:[%s4311_s22 + $0x8] sm:$0xff] }
 0x29c   : > { %v3249_v60 = vpop.f32.mrb[61].mxu0 }
 0x29d   : > { %v3250_v61 = vadd.f32 %v3249_v60, %v3248_v59  ;;  %v3251_v62 = vpop.f32.mrb[62].mxu0  ;;  %v973_v63 = vpack.c.bf16 %v956_v58, %v955_v57 }
 0x29e   : > { %v3252_v0 = vpop.f32.mrb[63].mxu0 }
 0x29f   : > { %v921_v1 = vadd.f32 %v3250_v61, %v4403_v4  ;;  %v3253_v2 = vadd.f32 %v3252_v0, %v3251_v62  ;;  %1256 = vmatmul.mubr.bf16.gmra.mrb[56].mxu1 %v973_v63  ;;  %v3462_v62 = vld [vmem:[#allocation15 + $0x40] ss:$8 sps:$4 sm:$0xff]   ;;  %v3464_v63 = vld [vmem:[#allocation15 + $0x44] ss:$8 sps:$4 sm:$0xff]  }
 0x2a0   : > { %1265 = vmatprep.mubr.bf16.mxu1 %v3922_v49  ;;  %2093 = vmatprep.subr.bf16.mxu1 %v3464_v63 }
 0x2a1   : > { %v924_v3 = vadd.f32 %v3253_v2, %v4403_v4  ;;  %v957_v5 = vmax.f32 %v921_v1, 0.0  ;;  %v4461_v4 = vrot.slane %v991_v10, %v4455_v12  ;;  %2094 = vmatpush1.bf16.msra.mxu1 %v3462_v62 }
 0x2a3   : > { %v958_v6 = vmax.f32 %v924_v3, 0.0 }
 0x2a5   : > { %v974_v7 = vpack.c.bf16 %v958_v6, %v957_v5  ;;  %v3467_v5 = vld [vmem:[#allocation15 + $0x54] ss:$8 sps:$4 sm:$0xff]  }
 0x2a6   : > { %2095 = vmatprep.subr.bf16.mxu1 %v3467_v5 }
 0x2a7   : > { %1266 = vmatmul.mubr.bf16.gmra.mrb[60].mxu1 %v974_v7 }
 0x2a8   : > { %2096 = vmatpush1.bf16.msra.mxu1 %v3465_v13 }
 0x302   : > { %v1117_v16 = vpop.f32.mrb[0].mxu1 }
 0x303   : > { %v4464_v17 = vadd.f32 %v1117_v16, %v4458_v15  ;;  %v1119_v18 = vpop.f32.mrb[1].mxu1  ;;  %v3470_v16 = vld [vmem:[#allocation15 + $0x64] ss:$8 sps:$4 sm:$0xff]  }
 0x304   : > { %v1120_v19 = vadd.f32 %v1119_v18, %v4461_v4  ;;  %v1121_v20 = vpop.f32.mrb[2].mxu1  ;;  %2097 = vmatprep.subr.bf16.mxu1 %v3470_v16  ;;  %v1282_v16 = vld [vmem:[%s4311_s22 + $0x30] sm:$0xff] }
 0x305   : > { %v4473_v23 = vadd.f32 %v1121_v20, %v4458_v15  ;;  %v1123_v24 = vpop.f32.mrb[3].mxu1  ;;  %v1278_v20 = vld [vmem:[%s4311_s22 + $0x10] sm:$0xff] }
 0x306   : > { %v1308_v26 = vmul.f32 0.5, %v1120_v19  ;;  %v3110_v27 = vpack.c.bf16 %v1120_v19, %v4464_v17  ;;  %v1124_v28 = vadd.f32 %v1123_v24, %v4461_v4 }
 0x308   : > { %v1340_v30 = vmul.f32 1.442695, %v1308_v26  ;;  %2694 = vst [vmem:[%s4470_s30 + $0x8] sm:$0xff] %v3110_v27  ;;  %v1309_v31 = vmul.f32 0.5, %v1124_v28  ;;  %v3111_v32 = vpack.c.bf16 %v1124_v28, %v4473_v23  ;;  %v1279_v27 = vld [vmem:[%s4311_s22 + $0x18] sm:$0xff] }
 0x30a   : > { %3498 = vpow2.f32 %v1340_v30  ;;  %v1342_v33 = vmul.f32 1.442695, %v1309_v31  ;;  %2695 = vst [vmem:[%s4470_s30 + $0x18] sm:$0xff] %v3111_v32  ;;  %v1127_v34 = vpop.f32.mrb[4].mxu1  ;;  %v3473_v31 = vld [vmem:[#allocation15 + $0x74] ss:$8 sps:$4 sm:$0xff]  }
 0x30b   : > { %v4481_v35 = vadd.f32 %v1127_v34, %v4458_v15  ;;  %v1129_v36 = vpop.f32.mrb[5].mxu1 }
 0x30c   : > { %3500 = vpow2.f32 %v1342_v33  ;;  %v1130_v37 = vadd.f32 %v1129_v36, %v4461_v4  ;;  %v1131_v38 = vpop.f32.mrb[6].mxu1 }
 0x30d   : > { %v4485_v39 = vadd.f32 %v1131_v38, %v4458_v15  ;;  %v1133_v40 = vpop.f32.mrb[7].mxu1 }
 0x30e   : > { %v1310_v43 = vmul.f32 0.5, %v1130_v37  ;;  %v3112_v44 = vpack.c.bf16 %v1130_v37, %v4481_v35  ;;  %v1134_v45 = vadd.f32 %v1133_v40, %v4461_v4 }
 0x310   : > { %v1344_v46 = vmul.f32 1.442695, %v1310_v43  ;;  %2696 = vst [vmem:[%s4470_s30 + $0x28] sm:$0xff] %v3112_v44  ;;  %v1311_v47 = vmul.f32 0.5, %v1134_v45  ;;  %v3113_v48 = vpack.c.bf16 %v1134_v45, %v4485_v39  ;;  %v3471_v43 = vld [vmem:[#allocation15 + $0x70] ss:$8 sps:$4 sm:$0xff]  }
 0x311   : > { %v3476_v45 = vld [vmem:[#allocation15 + $0x84] ss:$8 sps:$4 sm:$0xff]  }
 0x312   : > { %3502 = vpow2.f32 %v1344_v46  ;;  %v1346_v51 = vmul.f32 1.442695, %v1311_v47  ;;  %2697 = vst [vmem:[%s4470_s30 + $0x38] sm:$0xff] %v3113_v48  ;;  %v1137_v52 = vpop.f32.mrb[8].mxu1  ;;  %v1280_v48 = vld [vmem:[%s4311_s22 + $0x20] sm:$0xff] }
 0x313   : > { %v4494_v53 = vadd.f32 %v1137_v52, %v4458_v15  ;;  %v1139_v54 = vpop.f32.mrb[9].mxu1 }
 0x314   : > { %v3499_v55 = vpop.eup %3498  ;;  %3504 = vpow2.f32 %v1346_v51  ;;  %v1140_v57 = vadd.f32 %v1139_v54, %v4461_v4  ;;  %v1141_v58 = vpop.f32.mrb[10].mxu1 }
 0x315   : > { %v1404_v59 = vmul.f32 %v3499_v55, %v1276_v50  ;;  %v4499_v60 = vadd.f32 %v1141_v58, %v4458_v15  ;;  %v1143_v61 = vpop.f32.mrb[11].mxu1 }
 0x316   : > { %v3501_v0 = vpop.eup %3500  ;;  %v1312_v1 = vmul.f32 0.5, %v1140_v57  ;;  %v3114_v2 = vpack.c.bf16 %v1140_v57, %v4494_v53  ;;  %v1144_v3 = vadd.f32 %v1143_v61, %v4461_v4  ;;  %v3479_v61 = vld [vmem:[#allocation15 + $0x94] ss:$8 sps:$4 sm:$0xff]  }
 0x317   : > { %v1405_v6 = vmul.f32 %v3501_v0, %v1277_v56  ;;  %v1436_v7 = vadd.f32 %v1404_v59, %v4464_v17  ;;  %v1281_v56 = vld [vmem:[%s4311_s22 + $0x28] sm:$0xff] }
 0x318   : > { %v1348_v8 = vmul.f32 1.442695, %v1312_v1  ;;  %2698 = vst [vmem:[%s4470_s30 + $0x48] sm:$0xff] %v3114_v2  ;;  %v1313_v9 = vmul.f32 0.5, %v1144_v3  ;;  %v3115_v10 = vpack.c.bf16 %v1144_v3, %v4499_v60 }
 0x319   : > { %v1437_v14 = vadd.f32 %v1405_v6, %v4473_v23  ;;  %v3468_v23 = vld [vmem:[#allocation15 + $0x60] ss:$8 sps:$4 sm:$0xff]  }
 0x31a   : > { %3506 = vpow2.f32 %v1348_v8  ;;  %v1350_v18 = vmul.f32 1.442695, %v1313_v9  ;;  %2699 = vst [vmem:[%s4470_s30 + $0x58] sm:$0xff] %v3115_v10  ;;  %v1147_v19 = vpop.f32.mrb[12].mxu1  ;;  %2098 = vmatpush1.bf16.msra.mxu1 %v3468_v23  ;;  %v3477_v8 = vld [vmem:[#allocation15 + $0x90] ss:$8 sps:$4 sm:$0xff]  }
 0x31b   : > { %v4510_v17 = vadd.f32 %v1147_v19, %v4458_v15  ;;  %v1149_v21 = vpop.f32.mrb[13].mxu1  ;;  %v1468_v22 = vpack.c.bf16 %v1437_v14, %v1436_v7  ;;  %2099 = vmatprep.subr.bf16.mxu1 %v3473_v31  ;;  %v3482_v10 = vld [vmem:[#allocation15 + $0xa4] ss:$8 sps:$4 sm:$0xff]   ;;  %v3485_v23 = vld [vmem:[#allocation15 + $0xb4] ss:$8 sps:$4 sm:$0xff]  }
 0x31c   : > { %v3503_v24 = vpop.eup %3502  ;;  %3508 = vpow2.f32 %v1350_v18  ;;  %v1150_v25 = vadd.f32 %v1149_v21, %v4461_v4  ;;  %v1151_v26 = vpop.f32.mrb[14].mxu1 }
 0x31d   : > { %v4515_v28 = vadd.f32 %v1151_v26, %v4458_v15  ;;  %v1153_v29 = vpop.f32.mrb[15].mxu1  ;;  %1625 = vmatmul.mubr.bf16.vlgmr.msra.gmra.mrb[64].mxu0 %v1468_v22  ;;  %v1406_v30 = vmul.f32 %v3503_v24, %v1278_v20  ;;  %v1283_v24 = vld [vmem:[%s4311_s22 + $0x38] sm:$0xff] }
 0x31e   : > { %v3505_v32 = vpop.eup %3504  ;;  %v1314_v33 = vmul.f32 0.5, %v1150_v25  ;;  %v3116_v34 = vpack.c.bf16 %v1150_v25, %v4510_v17  ;;  %v1154_v36 = vadd.f32 %v1153_v29, %v4461_v4  ;;  %1634 = vmatprep.mubr.bf16.mxu0 %v3922_v49  ;;  %2100 = vmatpush1.bf16.msra.mxu1 %v3471_v43 }
 0x31f   : > { %v1407_v37 = vmul.f32 %v3505_v32, %v1279_v27  ;;  %v1438_v38 = vadd.f32 %v1406_v30, %v4481_v35  ;;  %2101 = vmatprep.subr.bf16.mxu1 %v3476_v45  ;;  %v1284_v45 = vld [vmem:[%s4311_s22 + $0x40] sm:$0xff] }
 0x320   : > { %v1352_v40 = vmul.f32 1.442695, %v1314_v33  ;;  %2700 = vst [vmem:[%s4470_s30 + $0x68] sm:$0xff] %v3116_v34  ;;  %v1315_v41 = vmul.f32 0.5, %v1154_v36  ;;  %v3117_v42 = vpack.c.bf16 %v1154_v36, %v4515_v28 }
 0x321   : > { %v1439_v44 = vadd.f32 %v1407_v37, %v4485_v39  ;;  %v3474_v39 = vld [vmem:[#allocation15 + $0x80] ss:$8 sps:$4 sm:$0xff]  }
 0x322   : > { %3510 = vpow2.f32 %v1352_v40  ;;  %v1354_v46 = vmul.f32 1.442695, %v1315_v41  ;;  %2701 = vst [vmem:[%s4470_s30 + $0x78] sm:$0xff] %v3117_v42  ;;  %v1157_v47 = vpop.f32.mrb[16].mxu1  ;;  %2102 = vmatpush1.bf16.msra.mxu1 %v3474_v39  ;;  %v3483_v40 = vld [vmem:[#allocation15 + $0xb0] ss:$8 sps:$4 sm:$0xff]  }
 0x323   : > { %v4527_v50 = vadd.f32 %v1157_v47, %v4458_v15  ;;  %v1159_v35 = vpop.f32.mrb[17].mxu1  ;;  %v1469_v51 = vpack.c.bf16 %v1439_v44, %v1438_v38  ;;  %2103 = vmatprep.subr.bf16.mxu1 %v3479_v61  ;;  %v3488_v42 = vld [vmem:[#allocation15 + $0xc4] ss:$8 sps:$4 sm:$0xff]   ;;  %v3491_v39 = vld [vmem:[#allocation15 + $0xd4] ss:$8 sps:$4 sm:$0xff]  }
 0x324   : > { %v3507_v52 = vpop.eup %3506  ;;  %3512 = vpow2.f32 %v1354_v46  ;;  %v1160_v54 = vadd.f32 %v1159_v35, %v4461_v4  ;;  %v1161_v55 = vpop.f32.mrb[18].mxu1 }
 0x325   : > { %v4532_v57 = vadd.f32 %v1161_v55, %v4458_v15  ;;  %v1163_v58 = vpop.f32.mrb[19].mxu1  ;;  %1635 = vmatmul.mubr.bf16.gmra.mrb[68].mxu0 %v1469_v51  ;;  %v1408_v59 = vmul.f32 %v3507_v52, %v1280_v48  ;;  %v1285_v52 = vld [vmem:[%s4311_s22 + $0x48] sm:$0xff] }
 0x326   : > { %v3509_v62 = vpop.eup %3508  ;;  %v1316_v63 = vmul.f32 0.5, %v1160_v54  ;;  %v3118_v0 = vpack.c.bf16 %v1160_v54, %v4527_v50  ;;  %v1164_v1 = vadd.f32 %v1163_v58, %v4461_v4  ;;  %1644 = vmatprep.mubr.bf16.mxu0 %v3922_v49  ;;  %2104 = vmatpush1.bf16.msra.mxu1 %v3477_v8 }
 0x327   : > { %v1409_v2 = vmul.f32 %v3509_v62, %v1281_v56  ;;  %v1440_v3 = vadd.f32 %v1408_v59, %v4494_v53  ;;  %2105 = vmatprep.subr.bf16.mxu1 %v3482_v10  ;;  %v1286_v10 = vld [vmem:[%s4311_s22 + $0x50] sm:$0xff] }
 0x328   : > { %v1356_v5 = vmul.f32 1.442695, %v1316_v63  ;;  %2702 = vst [vmem:[%s4470_s30 + $0x88] sm:$0xff] %v3118_v0  ;;  %v1317_v6 = vmul.f32 0.5, %v1164_v1  ;;  %v3119_v7 = vpack.c.bf16 %v1164_v1, %v4532_v57 }
 0x329   : > { %v1441_v9 = vadd.f32 %v1409_v2, %v4499_v60  ;;  %v3480_v60 = vld [vmem:[#allocation15 + $0xa0] ss:$8 sps:$4 sm:$0xff]  }
 0x32a   : > { %3514 = vpow2.f32 %v1356_v5  ;;  %v1358_v13 = vmul.f32 1.442695, %v1317_v6  ;;  %2703 = vst [vmem:[%s4470_s30 + $0x98] sm:$0xff] %v3119_v7  ;;  %v1167_v14 = vpop.f32.mrb[20].mxu1  ;;  %2106 = vmatpush1.bf16.msra.mxu1 %v3480_v60  ;;  %v3489_v5 = vld [vmem:[#allocation15 + $0xd0] ss:$8 sps:$4 sm:$0xff]  }
 0x32b   : > { %v4544_v18 = vadd.f32 %v1167_v14, %v4458_v15  ;;  %v1169_v53 = vpop.f32.mrb[21].mxu1  ;;  %v1470_v19 = vpack.c.bf16 %v1441_v9, %v1440_v3  ;;  %2107 = vmatprep.subr.bf16.mxu1 %v3485_v23  ;;  %v3494_v7 = vld [vmem:[#allocation15 + $0xe4] ss:$8 sps:$4 sm:$0xff]  }
 0x32c   : > { %v3511_v20 = vpop.eup %3510  ;;  %3516 = vpow2.f32 %v1358_v13  ;;  %v1170_v21 = vadd.f32 %v1169_v53, %v4461_v4  ;;  %v1171_v22 = vpop.f32.mrb[22].mxu1 }
 0x32d   : > { %v4549_v25 = vadd.f32 %v1171_v22, %v4458_v15  ;;  %v1173_v26 = vpop.f32.mrb[23].mxu1  ;;  %1645 = vmatmul.mubr.bf16.gmra.mrb[72].mxu0 %v1470_v19  ;;  %v1410_v27 = vmul.f32 %v3511_v20, %v1282_v16  ;;  %v1287_v20 = vld [vmem:[%s4311_s22 + $0x58] sm:$0xff] }
 0x32e   : > { %v3513_v29 = vpop.eup %3512  ;;  %v1318_v30 = vmul.f32 0.5, %v1170_v21  ;;  %v3120_v31 = vpack.c.bf16 %v1170_v21, %v4544_v18  ;;  %v1174_v32 = vadd.f32 %v1173_v26, %v4461_v4  ;;  %1654 = vmatprep.mubr.bf16.mxu0 %v3922_v49  ;;  %2108 = vmatpush1.bf16.msra.mxu1 %v3483_v40 }
 0x32f   : > { %v1411_v33 = vmul.f32 %v3513_v29, %v1283_v24  ;;  %v1442_v34 = vadd.f32 %v1410_v27, %v4510_v17  ;;  %2109 = vmatprep.subr.bf16.mxu1 %v3488_v42 }
 0x330   : > { %v1360_v36 = vmul.f32 1.442695, %v1318_v30  ;;  %2704 = vst [vmem:[%s4470_s30 + $0xa8] sm:$0xff] %v3120_v31  ;;  %v1319_v37 = vmul.f32 0.5, %v1174_v32  ;;  %v3121_v38 = vpack.c.bf16 %v1174_v32, %v4549_v25 }
 0x331   : > { %v1443_v41 = vadd.f32 %v1411_v33, %v4515_v28  ;;  %v3486_v28 = vld [vmem:[#allocation15 + $0xc0] ss:$8 sps:$4 sm:$0xff]  }
 0x332   : > { %3518 = vpow2.f32 %v1360_v36  ;;  %v1362_v43 = vmul.f32 1.442695, %v1319_v37  ;;  %2705 = vst [vmem:[%s4470_s30 + $0xb8] sm:$0xff] %v3121_v38  ;;  %v1177_v44 = vpop.f32.mrb[24].mxu1  ;;  %2110 = vmatpush1.bf16.msra.mxu1 %v3486_v28  ;;  %v1288_v38 = vld [vmem:[%s4311_s22 + $0x60] sm:$0xff] }
 0x333   : > { %v4561_v46 = vadd.f32 %v1177_v44, %v4458_v15  ;;  %v1179_v17 = vpop.f32.mrb[25].mxu1  ;;  %v1471_v47 = vpack.c.bf16 %v1443_v41, %v1442_v34  ;;  %2111 = vmatprep.subr.bf16.mxu1 %v3491_v39 }
 0x334   : > { %v3515_v48 = vpop.eup %3514  ;;  %3520 = vpow2.f32 %v1362_v43  ;;  %v1180_v35 = vadd.f32 %v1179_v17, %v4461_v4  ;;  %v1181_v51 = vpop.f32.mrb[26].mxu1 }
 0x335   : > { %v4566_v54 = vadd.f32 %v1181_v51, %v4458_v15  ;;  %v1183_v55 = vpop.f32.mrb[27].mxu1  ;;  %1655 = vmatmul.mubr.bf16.gmra.mrb[76].mxu0 %v1471_v47  ;;  %v1412_v56 = vmul.f32 %v3515_v48, %v1284_v45  ;;  %v1289_v45 = vld [vmem:[%s4311_s22 + $0x68] sm:$0xff] }
 0x336   : > { %v3517_v58 = vpop.eup %3516  ;;  %v1320_v59 = vmul.f32 0.5, %v1180_v35  ;;  %v3122_v61 = vpack.c.bf16 %v1180_v35, %v4561_v46  ;;  %v1184_v62 = vadd.f32 %v1183_v55, %v4461_v4  ;;  %1664 = vmatprep.mubr.bf16.mxu0 %v3922_v49  ;;  %2112 = vmatpush1.bf16.msra.mxu1 %v3489_v5 }
 0x337   : > { %v1413_v63 = vmul.f32 %v3517_v58, %v1285_v52  ;;  %v1444_v0 = vadd.f32 %v1412_v56, %v4527_v50  ;;  %2113 = vmatprep.subr.bf16.mxu1 %v3494_v7 }
 0x338   : > { %v1364_v1 = vmul.f32 1.442695, %v1320_v59  ;;  %2706 = vst [vmem:[%s4470_s30 + $0xc8] sm:$0xff] %v3122_v61  ;;  %v1321_v2 = vmul.f32 0.5, %v1184_v62  ;;  %v3123_v3 = vpack.c.bf16 %v1184_v62, %v4566_v54 }
 0x339   : > { %v1445_v6 = vadd.f32 %v1413_v63, %v4532_v57  ;;  %v3492_v57 = vld [vmem:[#allocation15 + $0xe0] ss:$8 sps:$4 sm:$0xff]  }
 0x33a   : > { %3522 = vpow2.f32 %v1364_v1  ;;  %v1366_v8 = vmul.f32 1.442695, %v1321_v2  ;;  %2707 = vst [vmem:[%s4470_s30 + $0xd8] sm:$0xff] %v3123_v3  ;;  %v1187_v9 = vpop.f32.mrb[28].mxu1  ;;  %2114 = vmatpush1.bf16.msra.mxu1 %v3492_v57  ;;  %v1290_v63 = vld [vmem:[%s4311_s22 + $0x70] sm:$0xff] }
 0x33b   : > { %v4578_v13 = vadd.f32 %v1187_v9, %v4458_v15  ;;  %v1189_v50 = vpop.f32.mrb[29].mxu1  ;;  %v1472_v14 = vpack.c.bf16 %v1445_v6, %v1444_v0  ;;  %v1291_v6 = vld [vmem:[%s4311_s22 + $0x78] sm:$0xff] }
 0x33c   : > { %v3519_v16 = vpop.eup %3518  ;;  %3524 = vpow2.f32 %v1366_v8  ;;  %v1190_v53 = vadd.f32 %v1189_v50, %v4461_v4  ;;  %v1191_v19 = vpop.f32.mrb[30].mxu1 }
 0x33d   : > { %v4583_v21 = vadd.f32 %v1191_v19, %v4458_v15  ;;  %v1193_v22 = vpop.f32.mrb[31].mxu1  ;;  %1665 = vmatmul.mubr.bf16.gmra.mrb[80].mxu0 %v1472_v14  ;;  %v1414_v24 = vmul.f32 %v3519_v16, %v1286_v10 }
 0x33e   : > { %v3521_v60 = vpop.eup %3520  ;;  %v1322_v26 = vmul.f32 0.5, %v1190_v53  ;;  %v3124_v27 = vpack.c.bf16 %v1190_v53, %v4578_v13  ;;  %v1194_v23 = vadd.f32 %v1193_v22, %v4461_v4  ;;  %1674 = vmatprep.mubr.bf16.mxu0 %v3922_v49 }
 0x33f   : > { %v1415_v29 = vmul.f32 %v3521_v60, %v1287_v20  ;;  %v1446_v30 = vadd.f32 %v1414_v24, %v4544_v18 }
 0x340   : > { %v1368_v31 = vmul.f32 1.442695, %v1322_v26  ;;  %2708 = vst [vmem:[%s4470_s30 + $0xe8] sm:$0xff] %v3124_v27  ;;  %v1323_v32 = vmul.f32 0.5, %v1194_v23  ;;  %v3125_v33 = vpack.c.bf16 %v1194_v23, %v4583_v21  ;;  %v1292_v26 = vld [vmem:[%s4311_s22 + $0x80] sm:$0xff] }
 0x341   : > { %v1447_v34 = vadd.f32 %v1415_v29, %v4549_v25 }
 0x342   : > { %3526 = vpow2.f32 %v1368_v31  ;;  %v1370_v36 = vmul.f32 1.442695, %v1323_v32  ;;  %2709 = vst [vmem:[%s4470_s30 + $0xf8] sm:$0xff] %v3125_v33  ;;  %v1197_v37 = vpop.f32.mrb[32].mxu1  ;;  %v1293_v32 = vld [vmem:[%s4311_s22 + $0x88] sm:$0xff] }
 0x343   : > { %v4595_v40 = vadd.f32 %v1197_v37, %v4458_v15  ;;  %v1199_v41 = vpop.f32.mrb[33].mxu1  ;;  %v1473_v42 = vpack.c.bf16 %v1447_v34, %v1446_v30 }
 0x344   : > { %v3523_v18 = vpop.eup %3522  ;;  %3528 = vpow2.f32 %v1370_v36  ;;  %v1200_v43 = vadd.f32 %v1199_v41, %v4461_v4  ;;  %v1201_v44 = vpop.f32.mrb[34].mxu1 }
 0x345   : > { %v4600_v17 = vadd.f32 %v1201_v44, %v4458_v15  ;;  %v1203_v25 = vpop.f32.mrb[35].mxu1  ;;  %1675 = vmatmul.mubr.bf16.gmra.mrb[84].mxu0 %v1473_v42  ;;  %v1416_v47 = vmul.f32 %v3523_v18, %v1288_v38 }
 0x346   : > { %v3525_v48 = vpop.eup %3524  ;;  %v1324_v35 = vmul.f32 0.5, %v1200_v43  ;;  %v3126_v51 = vpack.c.bf16 %v1200_v43, %v4595_v40  ;;  %v1204_v52 = vadd.f32 %v1203_v25, %v4461_v4  ;;  %1684 = vmatprep.mubr.bf16.mxu0 %v3922_v49 }
 0x347   : > { %v1417_v28 = vmul.f32 %v3525_v48, %v1289_v45  ;;  %v1448_v55 = vadd.f32 %v1416_v47, %v4561_v46 }
 0x348   : > { %v1372_v56 = vmul.f32 1.442695, %v1324_v35  ;;  %2710 = vst [vmem:[%s4470_s30 + $0x108] sm:$0xff] %v3126_v51  ;;  %v1325_v39 = vmul.f32 0.5, %v1204_v52  ;;  %v3127_v58 = vpack.c.bf16 %v1204_v52, %v4600_v17  ;;  %v1294_v35 = vld [vmem:[%s4311_s22 + $0x90] sm:$0xff] }
 0x349   : > { %v1449_v59 = vadd.f32 %v1417_v28, %v4566_v54 }
 0x34a   : > { %3530 = vpow2.f32 %v1372_v56  ;;  %v1374_v61 = vmul.f32 1.442695, %v1325_v39  ;;  %2711 = vst [vmem:[%s4470_s30 + $0x118] sm:$0xff] %v3127_v58  ;;  %v1207_v62 = vpop.f32.mrb[36].mxu1  ;;  %v1295_v39 = vld [vmem:[%s4311_s22 + $0x98] sm:$0xff] }
 0x34b   : > { %v4612_v0 = vadd.f32 %v1207_v62, %v4458_v15  ;;  %v1209_v1 = vpop.f32.mrb[37].mxu1  ;;  %v1474_v2 = vpack.c.bf16 %v1449_v59, %v1448_v55 }
 0x34c   : > { %v3527_v3 = vpop.eup %3526  ;;  %3532 = vpow2.f32 %v1374_v61  ;;  %v1210_v46 = vadd.f32 %v1209_v1, %v4461_v4  ;;  %v1211_v5 = vpop.f32.mrb[38].mxu1 }
 0x34d   : > { %v4617_v7 = vadd.f32 %v1211_v5, %v4458_v15  ;;  %v1213_v54 = vpop.f32.mrb[39].mxu1  ;;  %1685 = vmatmul.mubr.bf16.gmra.mrb[88].mxu0 %v1474_v2  ;;  %v1418_v8 = vmul.f32 %v3527_v3, %v1290_v63 }
 0x34e   : > { %v3529_v9 = vpop.eup %3528  ;;  %v1326_v10 = vmul.f32 0.5, %v1210_v46  ;;  %v3128_v50 = vpack.c.bf16 %v1210_v46, %v4612_v0  ;;  %v1214_v14 = vadd.f32 %v1213_v54, %v4461_v4  ;;  %1694 = vmatprep.mubr.bf16.mxu0 %v3922_v49 }
 0x34f   : > { %v1419_v16 = vmul.f32 %v3529_v9, %v1291_v6  ;;  %v1450_v53 = vadd.f32 %v1418_v8, %v4578_v13 }
 0x350   : > { %v1376_v19 = vmul.f32 1.442695, %v1326_v10  ;;  %2712 = vst [vmem:[%s4470_s30 + $0x128] sm:$0xff] %v3128_v50  ;;  %v1327_v20 = vmul.f32 0.5, %v1214_v14  ;;  %v3129_v57 = vpack.c.bf16 %v1214_v14, %v4617_v7  ;;  %v1296_v10 = vld [vmem:[%s4311_s22 + $0xa0] sm:$0xff] }
 0x351   : > { %v1451_v22 = vadd.f32 %v1419_v16, %v4583_v21 }
 0x352   : > { %3534 = vpow2.f32 %v1376_v19  ;;  %v1378_v24 = vmul.f32 1.442695, %v1327_v20  ;;  %2713 = vst [vmem:[%s4470_s30 + $0x138] sm:$0xff] %v3129_v57  ;;  %v1217_v60 = vpop.f32.mrb[40].mxu1  ;;  %v1297_v20 = vld [vmem:[%s4311_s22 + $0xa8] sm:$0xff] }
 0x353   : > { %v4629_v27 = vadd.f32 %v1217_v60, %v4458_v15  ;;  %v1219_v23 = vpop.f32.mrb[41].mxu1  ;;  %v1475_v29 = vpack.c.bf16 %v1451_v22, %v1450_v53 }
 0x354   : > { %v3531_v30 = vpop.eup %3530  ;;  %3536 = vpow2.f32 %v1378_v24  ;;  %v1220_v13 = vadd.f32 %v1219_v23, %v4461_v4  ;;  %v1221_v31 = vpop.f32.mrb[42].mxu1 }
 0x355   : > { %v4634_v33 = vadd.f32 %v1221_v31, %v4458_v15  ;;  %v1223_v21 = vpop.f32.mrb[43].mxu1  ;;  %1695 = vmatmul.mubr.bf16.gmra.mrb[92].mxu0 %v1475_v29  ;;  %v1420_v34 = vmul.f32 %v3531_v30, %v1292_v26 }
 0x356   : > { %v3533_v36 = vpop.eup %3532  ;;  %v1328_v37 = vmul.f32 0.5, %v1220_v13  ;;  %v3130_v38 = vpack.c.bf16 %v1220_v13, %v4629_v27  ;;  %v1224_v41 = vadd.f32 %v1223_v21, %v4461_v4  ;;  %1704 = vmatprep.mubr.bf16.mxu0 %v3922_v49 }
 0x357   : > { %v1421_v42 = vmul.f32 %v3533_v36, %v1293_v32  ;;  %v1452_v18 = vadd.f32 %v1420_v34, %v4595_v40 }
 0x358   : > { %v1380_v43 = vmul.f32 1.442695, %v1328_v37  ;;  %2714 = vst [vmem:[%s4470_s30 + $0x148] sm:$0xff] %v3130_v38  ;;  %v1329_v44 = vmul.f32 0.5, %v1224_v41  ;;  %v3131_v45 = vpack.c.bf16 %v1224_v41, %v4634_v33  ;;  %v1298_v37 = vld [vmem:[%s4311_s22 + $0xb0] sm:$0xff] }
 0x359   : > { %v1453_v25 = vadd.f32 %v1421_v42, %v4600_v17 }
 0x35a   : > { %3538 = vpow2.f32 %v1380_v43  ;;  %v1382_v47 = vmul.f32 1.442695, %v1329_v44  ;;  %2715 = vst [vmem:[%s4470_s30 + $0x158] sm:$0xff] %v3131_v45  ;;  %v1227_v48 = vpop.f32.mrb[44].mxu1  ;;  %v1299_v44 = vld [vmem:[%s4311_s22 + $0xb8] sm:$0xff] }
 0x35b   : > { %v4646_v51 = vadd.f32 %v1227_v48, %v4458_v15  ;;  %v1229_v52 = vpop.f32.mrb[45].mxu1  ;;  %v1476_v28 = vpack.c.bf16 %v1453_v25, %v1452_v18 }
 0x35c   : > { %v3535_v55 = vpop.eup %3534  ;;  %3540 = vpow2.f32 %v1382_v47  ;;  %v1230_v40 = vadd.f32 %v1229_v52, %v4461_v4  ;;  %v1231_v56 = vpop.f32.mrb[46].mxu1 }
 0x35d   : > { %v4651_v58 = vadd.f32 %v1231_v56, %v4458_v15  ;;  %v1233_v17 = vpop.f32.mrb[47].mxu1  ;;  %1705 = vmatmul.mubr.bf16.gmra.mrb[96].mxu0 %v1476_v28  ;;  %v1422_v59 = vmul.f32 %v3535_v55, %v1294_v35 }
 0x35e   : > { %v3537_v61 = vpop.eup %3536  ;;  %v1330_v62 = vmul.f32 0.5, %v1230_v40  ;;  %v3132_v63 = vpack.c.bf16 %v1230_v40, %v4646_v51  ;;  %v1234_v1 = vadd.f32 %v1233_v17, %v4461_v4  ;;  %1714 = vmatprep.mubr.bf16.mxu0 %v3922_v49 }
 0x35f   : > { %v1423_v2 = vmul.f32 %v3537_v61, %v1295_v39  ;;  %v1454_v3 = vadd.f32 %v1422_v59, %v4612_v0 }
 0x360   : > { %v1384_v46 = vmul.f32 1.442695, %v1330_v62  ;;  %2716 = vst [vmem:[%s4470_s30 + $0x168] sm:$0xff] %v3132_v63  ;;  %v1331_v5 = vmul.f32 0.5, %v1234_v1  ;;  %v3133_v6 = vpack.c.bf16 %v1234_v1, %v4651_v58  ;;  %v1300_v62 = vld [vmem:[%s4311_s22 + $0xc0] sm:$0xff] }
 0x361   : > { %v1455_v54 = vadd.f32 %v1423_v2, %v4617_v7 }
 0x362   : > { %3542 = vpow2.f32 %v1384_v46  ;;  %v1386_v8 = vmul.f32 1.442695, %v1331_v5  ;;  %2717 = vst [vmem:[%s4470_s30 + $0x178] sm:$0xff] %v3133_v6  ;;  %v1237_v9 = vpop.f32.mrb[48].mxu1  ;;  %v1301_v5 = vld [vmem:[%s4311_s22 + $0xc8] sm:$0xff] }
 0x363   : > { %v4663_v50 = vadd.f32 %v1237_v9, %v4458_v15  ;;  %v1239_v14 = vpop.f32.mrb[49].mxu1  ;;  %v1477_v16 = vpack.c.bf16 %v1455_v54, %v1454_v3 }
 0x364   : > { %v3539_v53 = vpop.eup %3538  ;;  %3544 = vpow2.f32 %v1386_v8  ;;  %v1240_v0 = vadd.f32 %v1239_v14, %v4461_v4  ;;  %v1241_v19 = vpop.f32.mrb[50].mxu1  ;;  %v3497_v8 = vld [vmem:[#allocation15 + $0xf4] ss:$8 sps:$4 sm:$0xff]  }
 0x365   : > { %v4668_v57 = vadd.f32 %v1241_v19, %v4458_v15  ;;  %v1243_v7 = vpop.f32.mrb[51].mxu1  ;;  %1715 = vmatmul.mubr.bf16.gmra.mrb[100].mxu0 %v1477_v16  ;;  %v1424_v22 = vmul.f32 %v3539_v53, %v1296_v10  ;;  %v3495_v53 = vld [vmem:[#allocation15 + $0xf0] ss:$8 sps:$4 sm:$0xff]   ;;  %2115 = vmatprep.subr.bf16.mxu1 %v3497_v8 }
 0x366   : > { %v3541_v24 = vpop.eup %3540  ;;  %v1332_v60 = vmul.f32 0.5, %v1240_v0  ;;  %v3134_v26 = vpack.c.bf16 %v1240_v0, %v4663_v50  ;;  %v1244_v23 = vadd.f32 %v1243_v7, %v4461_v4  ;;  %1724 = vmatprep.mubr.bf16.mxu0 %v3922_v49  ;;  %2116 = vmatpush1.bf16.msra.mxu1 %v3495_v53 }
 0x367   : > { %v1425_v29 = vmul.f32 %v3541_v24, %v1297_v20  ;;  %v1456_v30 = vadd.f32 %v1424_v22, %v4629_v27 }
 0x368   : > { %v1388_v13 = vmul.f32 1.442695, %v1332_v60  ;;  %2718 = vst [vmem:[%s4470_s30 + $0x188] sm:$0xff] %v3134_v26  ;;  %v1333_v31 = vmul.f32 0.5, %v1244_v23  ;;  %v3135_v32 = vpack.c.bf16 %v1244_v23, %v4668_v57  ;;  %v1302_v23 = vld [vmem:[%s4311_s22 + $0xd0] sm:$0xff] }
 0x369   : > { %v1457_v21 = vadd.f32 %v1425_v29, %v4634_v33 }
 0x36a   : > { %3546 = vpow2.f32 %v1388_v13  ;;  %v1390_v34 = vmul.f32 1.442695, %v1333_v31  ;;  %2719 = vst [vmem:[%s4470_s30 + $0x198] sm:$0xff] %v3135_v32  ;;  %v1247_v36 = vpop.f32.mrb[52].mxu1 }
 0x36b   : > { %v4680_v38 = vadd.f32 %v1247_v36, %v4458_v15  ;;  %v1249_v41 = vpop.f32.mrb[53].mxu1  ;;  %v1478_v42 = vpack.c.bf16 %v1457_v21, %v1456_v30  ;;  %v1303_v21 = vld [vmem:[%s4311_s22 + $0xd8] sm:$0xff] }
 0x36c   : > { %v3543_v18 = vpop.eup %3542  ;;  %3548 = vpow2.f32 %v1390_v34  ;;  %v1250_v27 = vadd.f32 %v1249_v41, %v4461_v4  ;;  %v1251_v43 = vpop.f32.mrb[54].mxu1 }
 0x36d   : > { %v4685_v45 = vadd.f32 %v1251_v43, %v4458_v15  ;;  %v1253_v33 = vpop.f32.mrb[55].mxu1  ;;  %1725 = vmatmul.mubr.bf16.gmra.mrb[104].mxu0 %v1478_v42  ;;  %v1426_v25 = vmul.f32 %v3543_v18, %v1298_v37 }
 0x36e   : > { %v3545_v47 = vpop.eup %3544  ;;  %v1334_v48 = vmul.f32 0.5, %v1250_v27  ;;  %v3136_v35 = vpack.c.bf16 %v1250_v27, %v4680_v38  ;;  %v1254_v52 = vadd.f32 %v1253_v33, %v4461_v4  ;;  %1734 = vmatprep.mubr.bf16.mxu0 %v3922_v49 }
 0x36f   : > { %v1427_v28 = vmul.f32 %v3545_v47, %v1299_v44  ;;  %v1458_v55 = vadd.f32 %v1426_v25, %v4646_v51 }
 0x370   : > { %v1392_v40 = vmul.f32 1.442695, %v1334_v48  ;;  %2720 = vst [vmem:[%s4470_s30 + $0x1a8] sm:$0xff] %v3136_v35  ;;  %v1335_v56 = vmul.f32 0.5, %v1254_v52  ;;  %v3137_v39 = vpack.c.bf16 %v1254_v52, %v4685_v45  ;;  %v1304_v48 = vld [vmem:[%s4311_s22 + $0xe0] sm:$0xff]  ;;  %v1305_v52 = vld [vmem:[%s4311_s22 + $0xe8] sm:$0xff] }
 0x371   : > { %v1459_v17 = vadd.f32 %v1427_v28, %v4651_v58 }
 0x372   : > { %3550 = vpow2.f32 %v1392_v40  ;;  %v1394_v59 = vmul.f32 1.442695, %v1335_v56  ;;  %2721 = vst [vmem:[%s4470_s30 + $0x1b8] sm:$0xff] %v3137_v39  ;;  %v1257_v61 = vpop.f32.mrb[56].mxu1  ;;  %v1306_v56 = vld [vmem:[%s4311_s22 + $0xf0] sm:$0xff] }
 0x373   : > { %v4697_v63 = vadd.f32 %v1257_v61, %v4458_v15  ;;  %v1259_v1 = vpop.f32.mrb[57].mxu1  ;;  %v1479_v2 = vpack.c.bf16 %v1459_v17, %v1458_v55 }
 0x374   : > { %v3547_v3 = vpop.eup %3546  ;;  %3552 = vpow2.f32 %v1394_v59  ;;  %v1260_v51 = vadd.f32 %v1259_v1, %v4461_v4  ;;  %v1261_v46 = vpop.f32.mrb[58].mxu1  ;;  %v1307_v59 = vld [vmem:[%s4311_s22 + $0xf8] sm:$0xff] }
 0x375   : > { %v4702_v6 = vadd.f32 %v1261_v46, %v4458_v15  ;;  %v1263_v58 = vpop.f32.mrb[59].mxu1  ;;  %1735 = vmatmul.mubr.bf16.gmra.mrb[108].mxu0 %v1479_v2  ;;  %v1428_v54 = vmul.f32 %v3547_v3, %v1300_v62  ;;  %v1500_v46 = vld [vmem:[#allocation13] sm:$0x3] }
 0x376   : > { %v3549_v9 = vpop.eup %3548  ;;  %v1336_v10 = vmul.f32 0.5, %v1260_v51  ;;  %v3138_v14 = vpack.c.bf16 %v1260_v51, %v4697_v63  ;;  %v1264_v16 = vadd.f32 %v1263_v58, %v4461_v4  ;;  %1744 = vmatprep.mubr.bf16.mxu0 %v3922_v49 }
 0x377   : > { %v1429_v0 = vmul.f32 %v3549_v9, %v1301_v5  ;;  %v1460_v19 = vadd.f32 %v1428_v54, %v4663_v50  ;;  %v4732_v5 = vrot.slane %v1500_v46, %v4453_v11 }
 0x378   : > { %v1396_v20 = vmul.f32 1.442695, %v1336_v10  ;;  %2722 = vst [vmem:[%s4470_s30 + $0x1c8] sm:$0xff] %v3138_v14  ;;  %v1337_v7 = vmul.f32 0.5, %v1264_v16  ;;  %v3139_v22 = vpack.c.bf16 %v1264_v16, %v4702_v6 }
 0x379   : > { %v1461_v24 = vadd.f32 %v1429_v0, %v4668_v57 }
 0x37a   : > { %3554 = vpow2.f32 %v1396_v20  ;;  %v1398_v60 = vmul.f32 1.442695, %v1337_v7  ;;  %2723 = vst [vmem:[%s4470_s30 + $0x1d8] sm:$0xff] %v3139_v22  ;;  %v1267_v26 = vpop.f32.mrb[60].mxu1 }
 0x37b   : > { %v1268_v29 = vadd.f32 %v1267_v26, %v4458_v15  ;;  %v1269_v30 = vpop.f32.mrb[61].mxu1  ;;  %v1480_v13 = vpack.c.bf16 %v1461_v24, %v1460_v19 }
 0x37c   : > { %v3551_v50 = vpop.eup %3550  ;;  %3556 = vpow2.f32 %v1398_v60  ;;  %v1270_v31 = vadd.f32 %v1269_v30, %v4461_v4  ;;  %v1271_v32 = vpop.f32.mrb[62].mxu1 }
 0x37d   : > { %v1272_v34 = vadd.f32 %v1271_v32, %v4458_v15  ;;  %v1273_v36 = vpop.f32.mrb[63].mxu1  ;;  %1745 = vmatmul.mubr.bf16.gmra.mrb[112].mxu0 %v1480_v13  ;;  %v1430_v57 = vmul.f32 %v3551_v50, %v1302_v23 }
 0x37e   : > { %v3553_v37 = vpop.eup %3552  ;;  %v1338_v41 = vmul.f32 0.5, %v1270_v31  ;;  %v3140_v42 = vpack.c.bf16 %v1270_v31, %v1268_v29  ;;  %v1274_v18 = vadd.f32 %v1273_v36, %v4461_v4  ;;  %1754 = vmatprep.mubr.bf16.mxu0 %v3922_v49 }
 0x37f   : > { %v1431_v27 = vmul.f32 %v3553_v37, %v1303_v21  ;;  %v1462_v43 = vadd.f32 %v1430_v57, %v4680_v38 }
 0x380   : > { %v1400_v44 = vmul.f32 1.442695, %v1338_v41  ;;  %2724 = vst [vmem:[%s4470_s30 + $0x1e8] sm:$0xff] %v3140_v42  ;;  %v1339_v33 = vmul.f32 0.5, %v1274_v18  ;;  %v3141_v15 = vpack.c.bf16 %v1274_v18, %v1272_v34 }
 0x381   : > { %v1463_v25 = vadd.f32 %v1431_v27, %v4685_v45 }
 0x382   : > { %3558 = vpow2.f32 %v1400_v44  ;;  %v1402_v47 = vmul.f32 1.442695, %v1339_v33  ;;  %2725 = vst [vmem:[%s4470_s30 + $0x1f8] sm:$0xff] %v3141_v15 }
 0x383   : > { %v1481_v35 = vpack.c.bf16 %v1463_v25, %v1462_v43 }
 0x384   : > { %v3555_v4 = vpop.eup %3554  ;;  %3560 = vpow2.f32 %v1402_v47 }
 0x385   : > { %1755 = vmatmul.mubr.bf16.gmra.mrb[116].mxu0 %v1481_v35  ;;  %v1432_v28 = vmul.f32 %v3555_v4, %v1304_v48 }
 0x386   : > { %v3557_v55 = vpop.eup %3556  ;;  %1764 = vmatprep.mubr.bf16.mxu0 %v3922_v49 }
 0x387   : > { %v1433_v38 = vmul.f32 %v3557_v55, %v1305_v52  ;;  %v1464_v40 = vadd.f32 %v1432_v28, %v4697_v63  ;;  %v4735_v63 = vrot.slane %v1500_v46, %v4455_v12 }
 0x389   : > { %v1465_v45 = vadd.f32 %v1433_v38, %v4702_v6 }
 0x38b   : > { %v1482_v39 = vpack.c.bf16 %v1465_v45, %v1464_v40 }
 0x38c   : > { %v3559_v17 = vpop.eup %3558 }
 0x38d   : > { %1765 = vmatmul.mubr.bf16.gmra.mrb[120].mxu0 %v1482_v39  ;;  %v1434_v61 = vmul.f32 %v3559_v17, %v1306_v56 }
 0x38e   : > { %v3561_v62 = vpop.eup %3560  ;;  %1774 = vmatprep.mubr.bf16.mxu0 %v3922_v49 }
 0x38f   : > { %v1435_v1 = vmul.f32 %v3561_v62, %v1307_v59  ;;  %v1466_v2 = vadd.f32 %v1434_v61, %v1268_v29 }
 0x391   : > { %v1467_v3 = vadd.f32 %v1435_v1, %v1272_v34 }
 0x393   : > { %v1483_v51 = vpack.c.bf16 %v1467_v3, %v1466_v2 }
 0x395   : > { %1775 = vmatmul.mubr.bf16.gmra.mrb[124].mxu0 %v1483_v51 }
 0x3f0   : > { %v1626_v6 = vpop.f32.mrb[64].mxu0 }
 0x3f1   : > { %v1627_v58 = vadd.f32 %v1626_v6, %v4732_v5  ;;  %v1628_v54 = vpop.f32.mrb[65].mxu0 }
 0x3f2   : > { %v1629_v8 = vadd.f32 %v1628_v54, %v4735_v63  ;;  %v1630_v9 = vpop.f32.mrb[66].mxu0 }
 0x3f3   : > { %v1631_v49 = vadd.f32 %v1630_v9, %v4732_v5  ;;  %v1632_v10 = vpop.f32.mrb[67].mxu0  ;;  %v1785_v16 = vmax.f32 %v1627_v58, 0.0 }
 0x3f4   : > { %v1633_v14 = vadd.f32 %v1632_v10, %v4735_v63  ;;  %v1786_v0 = vmax.f32 %v1629_v8, 0.0 }
 0x3f5   : > { %v1787_v53 = vmax.f32 %v1631_v49, 0.0 }
 0x3f6   : > { %v1788_v19 = vmax.f32 %v1633_v14, 0.0 }
 0x3f7   : > { %v1849_v20 = vpack.c.bf16 %v1787_v53, %v1785_v16 }
 0x3f8   : > { %v1850_v7 = vpack.c.bf16 %v1788_v19, %v1786_v0  ;;  %v1636_v22 = vpop.f32.mrb[68].mxu0 }
 0x3f9   : > { %v1637_v24 = vadd.f32 %v1636_v22, %v4732_v5  ;;  %v1638_v60 = vpop.f32.mrb[69].mxu0 }
 0x3fa   : > { %v1639_v26 = vadd.f32 %v1638_v60, %v4735_v63  ;;  %v1640_v23 = vpop.f32.mrb[70].mxu0  ;;  %2117 = vmatprep.mubr.bf16.mxu1 %v1850_v7 }
 0x3fb   : > { %v1641_v29 = vadd.f32 %v1640_v23, %v4732_v5  ;;  %v1642_v30 = vpop.f32.mrb[71].mxu0  ;;  %2118 = vmatmul.mubr.bf16.vlgmr.msra.gmra.mrb[64].mxu1 %v1849_v20  ;;  %v1789_v50 = vmax.f32 %v1637_v24, 0.0 }
 0x3fc   : > { %v1643_v13 = vadd.f32 %v1642_v30, %v4735_v63  ;;  %v1790_v32 = vmax.f32 %v1639_v26, 0.0 }
 0x3fd   : > { %v1791_v31 = vmax.f32 %v1641_v29, 0.0 }
 0x3fe   : > { %v1792_v21 = vmax.f32 %v1643_v13, 0.0 }
 0x3ff   : > { %v1851_v34 = vpack.c.bf16 %v1791_v31, %v1789_v50 }
 0x400   : > { %v1852_v36 = vpack.c.bf16 %v1792_v21, %v1790_v32  ;;  %v1646_v57 = vpop.f32.mrb[72].mxu0 }
 0x401   : > { %v1647_v37 = vadd.f32 %v1646_v57, %v4732_v5  ;;  %v1648_v41 = vpop.f32.mrb[73].mxu0 }
 0x402   : > { %v1649_v42 = vadd.f32 %v1648_v41, %v4735_v63  ;;  %v1650_v18 = vpop.f32.mrb[74].mxu0  ;;  %2127 = vmatprep.mubr.bf16.mxu1 %v1852_v36 }
 0x403   : > { %v1651_v27 = vadd.f32 %v1650_v18, %v4732_v5  ;;  %v1652_v43 = vpop.f32.mrb[75].mxu0  ;;  %2128 = vmatmul.mubr.bf16.gmra.mrb[68].mxu1 %v1851_v34  ;;  %v1793_v33 = vmax.f32 %v1647_v37, 0.0 }
 0x404   : > { %v1653_v44 = vadd.f32 %v1652_v43, %v4735_v63  ;;  %v1794_v25 = vmax.f32 %v1649_v42, 0.0 }
 0x405   : > { %v1795_v15 = vmax.f32 %v1651_v27, 0.0 }
 0x406   : > { %v1796_v47 = vmax.f32 %v1653_v44, 0.0 }
 0x407   : > { %v1853_v48 = vpack.c.bf16 %v1795_v15, %v1793_v33 }
 0x408   : > { %v1854_v35 = vpack.c.bf16 %v1796_v47, %v1794_v25  ;;  %v1656_v4 = vpop.f32.mrb[76].mxu0 }
 0x409   : > { %v1657_v52 = vadd.f32 %v1656_v4, %v4732_v5  ;;  %v1658_v28 = vpop.f32.mrb[77].mxu0 }
 0x40a   : > { %v1659_v55 = vadd.f32 %v1658_v28, %v4735_v63  ;;  %v1660_v38 = vpop.f32.mrb[78].mxu0  ;;  %2137 = vmatprep.mubr.bf16.mxu1 %v1854_v35 }
 0x40b   : > { %v1661_v40 = vadd.f32 %v1660_v38, %v4732_v5  ;;  %v1662_v45 = vpop.f32.mrb[79].mxu0  ;;  %2138 = vmatmul.mubr.bf16.gmra.mrb[72].mxu1 %v1853_v48  ;;  %v1797_v39 = vmax.f32 %v1657_v52, 0.0 }
 0x40c   : > { %v1663_v56 = vadd.f32 %v1662_v45, %v4735_v63  ;;  %v1798_v59 = vmax.f32 %v1659_v55, 0.0 }
 0x40d   : > { %v1799_v17 = vmax.f32 %v1661_v40, 0.0 }
 0x40e   : > { %v1800_v61 = vmax.f32 %v1663_v56, 0.0 }
 0x40f   : > { %v1855_v62 = vpack.c.bf16 %v1799_v17, %v1797_v39 }
 0x410   : > { %v1856_v1 = vpack.c.bf16 %v1800_v61, %v1798_v59  ;;  %v1666_v2 = vpop.f32.mrb[80].mxu0 }
 0x411   : > { %v1667_v3 = vadd.f32 %v1666_v2, %v4732_v5  ;;  %v1668_v51 = vpop.f32.mrb[81].mxu0 }
 0x412   : > { %v1669_v46 = vadd.f32 %v1668_v51, %v4735_v63  ;;  %v1670_v6 = vpop.f32.mrb[82].mxu0  ;;  %2147 = vmatprep.mubr.bf16.mxu1 %v1856_v1 }
 0x413   : > { %v1671_v58 = vadd.f32 %v1670_v6, %v4732_v5  ;;  %v1672_v54 = vpop.f32.mrb[83].mxu0  ;;  %2148 = vmatmul.mubr.bf16.gmra.mrb[76].mxu1 %v1855_v62  ;;  %v1801_v9 = vmax.f32 %v1667_v3, 0.0 }
 0x414   : > { %v1673_v8 = vadd.f32 %v1672_v54, %v4735_v63  ;;  %v1802_v10 = vmax.f32 %v1669_v46, 0.0 }
 0x415   : > { %v1803_v49 = vmax.f32 %v1671_v58, 0.0 }
 0x416   : > { %v1804_v14 = vmax.f32 %v1673_v8, 0.0 }
 0x417   : > { %v1857_v16 = vpack.c.bf16 %v1803_v49, %v1801_v9 }
 0x418   : > { %v1858_v53 = vpack.c.bf16 %v1804_v14, %v1802_v10  ;;  %v1676_v0 = vpop.f32.mrb[84].mxu0 }
 0x419   : > { %v1677_v19 = vadd.f32 %v1676_v0, %v4732_v5  ;;  %v1678_v20 = vpop.f32.mrb[85].mxu0 }
 0x41a   : > { %v1679_v7 = vadd.f32 %v1678_v20, %v4735_v63  ;;  %v1680_v22 = vpop.f32.mrb[86].mxu0  ;;  %2157 = vmatprep.mubr.bf16.mxu1 %v1858_v53 }
 0x41b   : > { %v1681_v24 = vadd.f32 %v1680_v22, %v4732_v5  ;;  %v1682_v60 = vpop.f32.mrb[87].mxu0  ;;  %2158 = vmatmul.mubr.bf16.gmra.mrb[80].mxu1 %v1857_v16  ;;  %v1805_v23 = vmax.f32 %v1677_v19, 0.0 }
 0x41c   : > { %v1683_v26 = vadd.f32 %v1682_v60, %v4735_v63  ;;  %v1806_v30 = vmax.f32 %v1679_v7, 0.0 }
 0x41d   : > { %v1807_v29 = vmax.f32 %v1681_v24, 0.0 }
 0x41e   : > { %v1808_v13 = vmax.f32 %v1683_v26, 0.0 }
 0x41f   : > { %v1859_v50 = vpack.c.bf16 %v1807_v29, %v1805_v23 }
 0x420   : > { %v1860_v31 = vpack.c.bf16 %v1808_v13, %v1806_v30  ;;  %v1686_v32 = vpop.f32.mrb[88].mxu0 }
 0x421   : > { %v1687_v21 = vadd.f32 %v1686_v32, %v4732_v5  ;;  %v1688_v34 = vpop.f32.mrb[89].mxu0 }
 0x422   : > { %v1689_v36 = vadd.f32 %v1688_v34, %v4735_v63  ;;  %v1690_v57 = vpop.f32.mrb[90].mxu0  ;;  %2167 = vmatprep.mubr.bf16.mxu1 %v1860_v31 }
 0x423   : > { %v1691_v37 = vadd.f32 %v1690_v57, %v4732_v5  ;;  %v1692_v41 = vpop.f32.mrb[91].mxu0  ;;  %2168 = vmatmul.mubr.bf16.gmra.mrb[84].mxu1 %v1859_v50  ;;  %v1809_v18 = vmax.f32 %v1687_v21, 0.0 }
 0x424   : > { %v1693_v42 = vadd.f32 %v1692_v41, %v4735_v63  ;;  %v1810_v43 = vmax.f32 %v1689_v36, 0.0 }
 0x425   : > { %v1811_v27 = vmax.f32 %v1691_v37, 0.0 }
 0x426   : > { %v1812_v44 = vmax.f32 %v1693_v42, 0.0 }
 0x427   : > { %v1861_v33 = vpack.c.bf16 %v1811_v27, %v1809_v18 }
 0x428   : > { %v1862_v15 = vpack.c.bf16 %v1812_v44, %v1810_v43  ;;  %v1696_v25 = vpop.f32.mrb[92].mxu0 }
 0x429   : > { %v1697_v47 = vadd.f32 %v1696_v25, %v4732_v5  ;;  %v1698_v48 = vpop.f32.mrb[93].mxu0 }
 0x42a   : > { %v1699_v35 = vadd.f32 %v1698_v48, %v4735_v63  ;;  %v1700_v4 = vpop.f32.mrb[94].mxu0  ;;  %2177 = vmatprep.mubr.bf16.mxu1 %v1862_v15 }
 0x42b   : > { %v1701_v52 = vadd.f32 %v1700_v4, %v4732_v5  ;;  %v1702_v28 = vpop.f32.mrb[95].mxu0  ;;  %2178 = vmatmul.mubr.bf16.gmra.mrb[88].mxu1 %v1861_v33  ;;  %v1813_v38 = vmax.f32 %v1697_v47, 0.0 }
 0x42c   : > { %v1703_v55 = vadd.f32 %v1702_v28, %v4735_v63  ;;  %v1814_v45 = vmax.f32 %v1699_v35, 0.0 }
 0x42d   : > { %v1815_v40 = vmax.f32 %v1701_v52, 0.0 }
 0x42e   : > { %v1816_v56 = vmax.f32 %v1703_v55, 0.0 }
 0x42f   : > { %v1863_v39 = vpack.c.bf16 %v1815_v40, %v1813_v38 }
 0x430   : > { %v1864_v17 = vpack.c.bf16 %v1816_v56, %v1814_v45  ;;  %v1706_v59 = vpop.f32.mrb[96].mxu0 }
 0x431   : > { %v1707_v61 = vadd.f32 %v1706_v59, %v4732_v5  ;;  %v1708_v62 = vpop.f32.mrb[97].mxu0 }
 0x432   : > { %v1709_v1 = vadd.f32 %v1708_v62, %v4735_v63  ;;  %v1710_v2 = vpop.f32.mrb[98].mxu0  ;;  %2187 = vmatprep.mubr.bf16.mxu1 %v1864_v17 }
 0x433   : > { %v1711_v3 = vadd.f32 %v1710_v2, %v4732_v5  ;;  %v1712_v51 = vpop.f32.mrb[99].mxu0  ;;  %2188 = vmatmul.mubr.bf16.gmra.mrb[92].mxu1 %v1863_v39  ;;  %v1817_v6 = vmax.f32 %v1707_v61, 0.0 }
 0x434   : > { %v1713_v46 = vadd.f32 %v1712_v51, %v4735_v63  ;;  %v1818_v54 = vmax.f32 %v1709_v1, 0.0 }
 0x435   : > { %v1819_v58 = vmax.f32 %v1711_v3, 0.0 }
 0x436   : > { %v1820_v8 = vmax.f32 %v1713_v46, 0.0 }
 0x437   : > { %v1865_v9 = vpack.c.bf16 %v1819_v58, %v1817_v6 }
 0x438   : > { %v1866_v49 = vpack.c.bf16 %v1820_v8, %v1818_v54  ;;  %v1716_v10 = vpop.f32.mrb[100].mxu0 }
 0x439   : > { %v1717_v14 = vadd.f32 %v1716_v10, %v4732_v5  ;;  %v1718_v16 = vpop.f32.mrb[101].mxu0 }
 0x43a   : > { %v1719_v53 = vadd.f32 %v1718_v16, %v4735_v63  ;;  %v1720_v0 = vpop.f32.mrb[102].mxu0  ;;  %2197 = vmatprep.mubr.bf16.mxu1 %v1866_v49 }
 0x43b   : > { %v1721_v19 = vadd.f32 %v1720_v0, %v4732_v5  ;;  %v1722_v20 = vpop.f32.mrb[103].mxu0  ;;  %2198 = vmatmul.mubr.bf16.gmra.mrb[96].mxu1 %v1865_v9  ;;  %v1821_v22 = vmax.f32 %v1717_v14, 0.0 }
 0x43c   : > { %v1723_v7 = vadd.f32 %v1722_v20, %v4735_v63  ;;  %v1822_v60 = vmax.f32 %v1719_v53, 0.0 }
 0x43d   : > { %v1823_v24 = vmax.f32 %v1721_v19, 0.0 }
 0x43e   : > { %v1824_v26 = vmax.f32 %v1723_v7, 0.0 }
 0x43f   : > { %v1867_v23 = vpack.c.bf16 %v1823_v24, %v1821_v22 }
 0x440   : > { %v1868_v29 = vpack.c.bf16 %v1824_v26, %v1822_v60  ;;  %v1726_v30 = vpop.f32.mrb[104].mxu0 }
 0x441   : > { %v1727_v13 = vadd.f32 %v1726_v30, %v4732_v5  ;;  %v1728_v50 = vpop.f32.mrb[105].mxu0 }
 0x442   : > { %v1729_v31 = vadd.f32 %v1728_v50, %v4735_v63  ;;  %v1730_v32 = vpop.f32.mrb[106].mxu0  ;;  %2207 = vmatprep.mubr.bf16.mxu1 %v1868_v29 }
 0x443   : > { %v1731_v21 = vadd.f32 %v1730_v32, %v4732_v5  ;;  %v1732_v34 = vpop.f32.mrb[107].mxu0  ;;  %2208 = vmatmul.mubr.bf16.gmra.mrb[100].mxu1 %v1867_v23  ;;  %v1825_v57 = vmax.f32 %v1727_v13, 0.0 }
 0x444   : > { %v1733_v36 = vadd.f32 %v1732_v34, %v4735_v63  ;;  %v1826_v41 = vmax.f32 %v1729_v31, 0.0 }
 0x445   : > { %v1827_v37 = vmax.f32 %v1731_v21, 0.0 }
 0x446   : > { %v1828_v42 = vmax.f32 %v1733_v36, 0.0 }
 0x447   : > { %v1869_v18 = vpack.c.bf16 %v1827_v37, %v1825_v57 }
 0x448   : > { %v1870_v27 = vpack.c.bf16 %v1828_v42, %v1826_v41  ;;  %v1736_v43 = vpop.f32.mrb[108].mxu0 }
 0x449   : > { %v1737_v44 = vadd.f32 %v1736_v43, %v4732_v5  ;;  %v1738_v33 = vpop.f32.mrb[109].mxu0 }
 0x44a   : > { %v1739_v15 = vadd.f32 %v1738_v33, %v4735_v63  ;;  %v1740_v25 = vpop.f32.mrb[110].mxu0  ;;  %2217 = vmatprep.mubr.bf16.mxu1 %v1870_v27 }
 0x44b   : > { %v1741_v47 = vadd.f32 %v1740_v25, %v4732_v5  ;;  %v1742_v48 = vpop.f32.mrb[111].mxu0  ;;  %2218 = vmatmul.mubr.bf16.gmra.mrb[104].mxu1 %v1869_v18  ;;  %v1829_v4 = vmax.f32 %v1737_v44, 0.0 }
 0x44c   : > { %v1743_v35 = vadd.f32 %v1742_v48, %v4735_v63  ;;  %v1830_v28 = vmax.f32 %v1739_v15, 0.0 }
 0x44d   : > { %v1831_v52 = vmax.f32 %v1741_v47, 0.0 }
 0x44e   : > { %v1832_v55 = vmax.f32 %v1743_v35, 0.0 }
 0x44f   : > { %v1871_v38 = vpack.c.bf16 %v1831_v52, %v1829_v4 }
 0x450   : > { %v1872_v40 = vpack.c.bf16 %v1832_v55, %v1830_v28  ;;  %v1746_v45 = vpop.f32.mrb[112].mxu0  ;;  %v1913_v28 = vld [vmem:[#allocation16] sm:$0x3] }
 0x451   : > { %v1747_v56 = vadd.f32 %v1746_v45, %v4732_v5  ;;  %v1748_v39 = vpop.f32.mrb[113].mxu0  ;;  %v4802_v55 = vrot.slane %v1913_v28, %v4453_v11 }
 0x452   : > { %v1749_v17 = vadd.f32 %v1748_v39, %v4735_v63  ;;  %v1750_v59 = vpop.f32.mrb[114].mxu0  ;;  %2227 = vmatprep.mubr.bf16.mxu1 %v1872_v40 }
 0x453   : > { %v1751_v61 = vadd.f32 %v1750_v59, %v4732_v5  ;;  %v1752_v62 = vpop.f32.mrb[115].mxu0  ;;  %2228 = vmatmul.mubr.bf16.gmra.mrb[108].mxu1 %v1871_v38  ;;  %v1833_v2 = vmax.f32 %v1747_v56, 0.0 }
 0x454   : > { %v1753_v1 = vadd.f32 %v1752_v62, %v4735_v63  ;;  %v1834_v51 = vmax.f32 %v1749_v17, 0.0 }
 0x455   : > { %v1835_v3 = vmax.f32 %v1751_v61, 0.0 }
 0x456   : > { %v1836_v46 = vmax.f32 %v1753_v1, 0.0 }
 0x457   : > { %v1873_v6 = vpack.c.bf16 %v1835_v3, %v1833_v2 }
 0x458   : > { %v1874_v58 = vpack.c.bf16 %v1836_v46, %v1834_v51  ;;  %v1756_v54 = vpop.f32.mrb[116].mxu0 }
 0x459   : > { %v1757_v8 = vadd.f32 %v1756_v54, %v4732_v5  ;;  %v1758_v9 = vpop.f32.mrb[117].mxu0 }
 0x45a   : > { %v1759_v49 = vadd.f32 %v1758_v9, %v4735_v63  ;;  %v1760_v10 = vpop.f32.mrb[118].mxu0  ;;  %2237 = vmatprep.mubr.bf16.mxu1 %v1874_v58 }
 0x45b   : > { %v1761_v14 = vadd.f32 %v1760_v10, %v4732_v5  ;;  %v1762_v16 = vpop.f32.mrb[119].mxu0  ;;  %2238 = vmatmul.mubr.bf16.gmra.mrb[112].mxu1 %v1873_v6  ;;  %v1837_v0 = vmax.f32 %v1757_v8, 0.0 }
 0x45c   : > { %v1763_v53 = vadd.f32 %v1762_v16, %v4735_v63  ;;  %v1838_v20 = vmax.f32 %v1759_v49, 0.0 }
 0x45d   : > { %v1839_v19 = vmax.f32 %v1761_v14, 0.0 }
 0x45e   : > { %v1840_v7 = vmax.f32 %v1763_v53, 0.0 }
 0x45f   : > { %v1875_v22 = vpack.c.bf16 %v1839_v19, %v1837_v0 }
 0x460   : > { %v1876_v24 = vpack.c.bf16 %v1840_v7, %v1838_v20  ;;  %v1766_v60 = vpop.f32.mrb[120].mxu0 }
 0x461   : > { %v1767_v26 = vadd.f32 %v1766_v60, %v4732_v5  ;;  %v1768_v23 = vpop.f32.mrb[121].mxu0 }
 0x462   : > { %v1769_v29 = vadd.f32 %v1768_v23, %v4735_v63  ;;  %v1770_v30 = vpop.f32.mrb[122].mxu0  ;;  %2247 = vmatprep.mubr.bf16.mxu1 %v1876_v24 }
 0x463   : > { %v1771_v13 = vadd.f32 %v1770_v30, %v4732_v5  ;;  %v1772_v50 = vpop.f32.mrb[123].mxu0  ;;  %2248 = vmatmul.mubr.bf16.gmra.mrb[116].mxu1 %v1875_v22  ;;  %v1841_v32 = vmax.f32 %v1767_v26, 0.0 }
 0x464   : > { %v1773_v31 = vadd.f32 %v1772_v50, %v4735_v63  ;;  %v1842_v34 = vmax.f32 %v1769_v29, 0.0 }
 0x465   : > { %v1843_v21 = vmax.f32 %v1771_v13, 0.0 }
 0x466   : > { %v1844_v36 = vmax.f32 %v1773_v31, 0.0 }
 0x467   : > { %v1877_v57 = vpack.c.bf16 %v1843_v21, %v1841_v32 }
 0x468   : > { %v1878_v37 = vpack.c.bf16 %v1844_v36, %v1842_v34  ;;  %v1776_v41 = vpop.f32.mrb[124].mxu0 }
 0x469   : > { %v1777_v42 = vadd.f32 %v1776_v41, %v4732_v5  ;;  %v1778_v18 = vpop.f32.mrb[125].mxu0 }
 0x46a   : > { %v1779_v27 = vadd.f32 %v1778_v18, %v4735_v63  ;;  %v1780_v43 = vpop.f32.mrb[126].mxu0  ;;  %2257 = vmatprep.mubr.bf16.mxu1 %v1878_v37 }
 0x46b   : > { %v1781_v44 = vadd.f32 %v1780_v43, %v4732_v5  ;;  %v1782_v33 = vpop.f32.mrb[127].mxu0  ;;  %2258 = vmatmul.mubr.bf16.gmra.mrb[120].mxu1 %v1877_v57  ;;  %v1845_v25 = vmax.f32 %v1777_v42, 0.0  ;;  %v4805_v5 = vrot.slane %v1913_v28, %v4455_v12 }
 0x46c   : > { %v1783_v15 = vadd.f32 %v1782_v33, %v4735_v63  ;;  %v1846_v48 = vmax.f32 %v1779_v27, 0.0 }
 0x46d   : > { %v1847_v47 = vmax.f32 %v1781_v44, 0.0 }
 0x46e   : > { %v1848_v35 = vmax.f32 %v1783_v15, 0.0 }
 0x46f   : > { %v1879_v4 = vpack.c.bf16 %v1847_v47, %v1845_v25 }
 0x470   : > { %v1880_v52 = vpack.c.bf16 %v1848_v35, %v1846_v48 }
 0x472   : > { %2267 = vmatprep.mubr.bf16.mxu1 %v1880_v52 }
 0x473   : > { %2268 = vmatmul.mubr.bf16.gmra.mrb[124].mxu1 %v1879_v4 }
 0x4ce   : > { %v2119_v38 = vpop.f32.mrb[64].mxu1 }
 0x4cf   : > { %v2120_v63 = vadd.f32 %v2119_v38, %v4802_v55  ;;  %v2121_v40 = vpop.f32.mrb[65].mxu1 }
 0x4d0   : > { %v2122_v45 = vadd.f32 %v2121_v40, %v4805_v5  ;;  %v2123_v56 = vpop.f32.mrb[66].mxu1 }
 0x4d1   : > { %v2124_v39 = vadd.f32 %v2123_v56, %v4802_v55  ;;  %v2125_v17 = vpop.f32.mrb[67].mxu1 }
 0x4d2   : > { %v3078_v59 = vpack.c.bf16 %v2122_v45, %v2120_v63  ;;  %v2126_v61 = vadd.f32 %v2125_v17, %v4805_v5 }
 0x4d4   : > { %2470 = vst [vmem:[%s4470_s30] sm:$0xff] %v3078_v59  ;;  %v3079_v11 = vpack.c.bf16 %v2126_v61, %v2124_v39 }
 0x4d6   : > { %2471 = vst [vmem:[%s4470_s30 + $0x10] sm:$0xff] %v3079_v11  ;;  %v2129_v12 = vpop.f32.mrb[68].mxu1 }
 0x4d7   : > { %v2130_v62 = vadd.f32 %v2129_v12, %v4802_v55  ;;  %v2131_v1 = vpop.f32.mrb[69].mxu1 }
 0x4d8   : > { %v2132_v2 = vadd.f32 %v2131_v1, %v4805_v5  ;;  %v2133_v3 = vpop.f32.mrb[70].mxu1 }
 0x4d9   : > { %v2134_v51 = vadd.f32 %v2133_v3, %v4802_v55  ;;  %v2135_v46 = vpop.f32.mrb[71].mxu1 }
 0x4da   : > { %v3080_v6 = vpack.c.bf16 %v2132_v2, %v2130_v62  ;;  %v2136_v58 = vadd.f32 %v2135_v46, %v4805_v5 }
 0x4dc   : > { %2472 = vst [vmem:[%s4470_s30 + $0x20] sm:$0xff] %v3080_v6  ;;  %v3081_v54 = vpack.c.bf16 %v2136_v58, %v2134_v51 }
 0x4de   : > { %2473 = vst [vmem:[%s4470_s30 + $0x30] sm:$0xff] %v3081_v54  ;;  %v2139_v8 = vpop.f32.mrb[72].mxu1 }
 0x4df   : > { %v2140_v9 = vadd.f32 %v2139_v8, %v4802_v55  ;;  %v2141_v49 = vpop.f32.mrb[73].mxu1 }
 0x4e0   : > { %v2142_v10 = vadd.f32 %v2141_v49, %v4805_v5  ;;  %v2143_v14 = vpop.f32.mrb[74].mxu1 }
 0x4e1   : > { %v2144_v16 = vadd.f32 %v2143_v14, %v4802_v55  ;;  %v2145_v53 = vpop.f32.mrb[75].mxu1 }
 0x4e2   : > { %v3082_v0 = vpack.c.bf16 %v2142_v10, %v2140_v9  ;;  %v2146_v19 = vadd.f32 %v2145_v53, %v4805_v5 }
 0x4e4   : > { %2474 = vst [vmem:[%s4470_s30 + $0x40] sm:$0xff] %v3082_v0  ;;  %v3083_v20 = vpack.c.bf16 %v2146_v19, %v2144_v16 }
 0x4e6   : > { %2475 = vst [vmem:[%s4470_s30 + $0x50] sm:$0xff] %v3083_v20  ;;  %v2149_v7 = vpop.f32.mrb[76].mxu1 }
 0x4e7   : > { %v2150_v22 = vadd.f32 %v2149_v7, %v4802_v55  ;;  %v2151_v24 = vpop.f32.mrb[77].mxu1 }
 0x4e8   : > { %v2152_v60 = vadd.f32 %v2151_v24, %v4805_v5  ;;  %v2153_v26 = vpop.f32.mrb[78].mxu1 }
 0x4e9   : > { %v2154_v23 = vadd.f32 %v2153_v26, %v4802_v55  ;;  %v2155_v29 = vpop.f32.mrb[79].mxu1 }
 0x4ea   : > { %v3084_v30 = vpack.c.bf16 %v2152_v60, %v2150_v22  ;;  %v2156_v13 = vadd.f32 %v2155_v29, %v4805_v5 }
 0x4ec   : > { %2476 = vst [vmem:[%s4470_s30 + $0x60] sm:$0xff] %v3084_v30  ;;  %v3085_v50 = vpack.c.bf16 %v2156_v13, %v2154_v23 }
 0x4ee   : > { %2477 = vst [vmem:[%s4470_s30 + $0x70] sm:$0xff] %v3085_v50  ;;  %v2159_v31 = vpop.f32.mrb[80].mxu1 }
 0x4ef   : > { %v2160_v32 = vadd.f32 %v2159_v31, %v4802_v55  ;;  %v2161_v21 = vpop.f32.mrb[81].mxu1 }
 0x4f0   : > { %v2162_v34 = vadd.f32 %v2161_v21, %v4805_v5  ;;  %v2163_v36 = vpop.f32.mrb[82].mxu1 }
 0x4f1   : > { %v2164_v57 = vadd.f32 %v2163_v36, %v4802_v55  ;;  %v2165_v37 = vpop.f32.mrb[83].mxu1 }
 0x4f2   : > { %v3086_v41 = vpack.c.bf16 %v2162_v34, %v2160_v32  ;;  %v2166_v42 = vadd.f32 %v2165_v37, %v4805_v5 }
 0x4f4   : > { %2478 = vst [vmem:[%s4470_s30 + $0x80] sm:$0xff] %v3086_v41  ;;  %v3087_v18 = vpack.c.bf16 %v2166_v42, %v2164_v57 }
 0x4f6   : > { %2479 = vst [vmem:[%s4470_s30 + $0x90] sm:$0xff] %v3087_v18  ;;  %v2169_v27 = vpop.f32.mrb[84].mxu1 }
 0x4f7   : > { %v2170_v43 = vadd.f32 %v2169_v27, %v4802_v55  ;;  %v2171_v44 = vpop.f32.mrb[85].mxu1 }
 0x4f8   : > { %v2172_v33 = vadd.f32 %v2171_v44, %v4805_v5  ;;  %v2173_v15 = vpop.f32.mrb[86].mxu1 }
 0x4f9   : > { %v2174_v25 = vadd.f32 %v2173_v15, %v4802_v55  ;;  %v2175_v47 = vpop.f32.mrb[87].mxu1 }
 0x4fa   : > { %v3088_v48 = vpack.c.bf16 %v2172_v33, %v2170_v43  ;;  %v2176_v35 = vadd.f32 %v2175_v47, %v4805_v5 }
 0x4fc   : > { %2480 = vst [vmem:[%s4470_s30 + $0xa0] sm:$0xff] %v3088_v48  ;;  %v3089_v4 = vpack.c.bf16 %v2176_v35, %v2174_v25 }
 0x4fe   : > { %2481 = vst [vmem:[%s4470_s30 + $0xb0] sm:$0xff] %v3089_v4  ;;  %v2179_v52 = vpop.f32.mrb[88].mxu1 }
 0x4ff   : > { %v2180_v28 = vadd.f32 %v2179_v52, %v4802_v55  ;;  %v2181_v38 = vpop.f32.mrb[89].mxu1 }
 0x500   : > { %v2182_v63 = vadd.f32 %v2181_v38, %v4805_v5  ;;  %v2183_v40 = vpop.f32.mrb[90].mxu1 }
 0x501   : > { %v2184_v45 = vadd.f32 %v2183_v40, %v4802_v55  ;;  %v2185_v56 = vpop.f32.mrb[91].mxu1 }
 0x502   : > { %v3090_v39 = vpack.c.bf16 %v2182_v63, %v2180_v28  ;;  %v2186_v17 = vadd.f32 %v2185_v56, %v4805_v5 }
 0x504   : > { %2482 = vst [vmem:[%s4470_s30 + $0xc0] sm:$0xff] %v3090_v39  ;;  %v3091_v59 = vpack.c.bf16 %v2186_v17, %v2184_v45 }
 0x506   : > { %2483 = vst [vmem:[%s4470_s30 + $0xd0] sm:$0xff] %v3091_v59  ;;  %v2189_v61 = vpop.f32.mrb[92].mxu1 }
 0x507   : > { %v2190_v11 = vadd.f32 %v2189_v61, %v4802_v55  ;;  %v2191_v12 = vpop.f32.mrb[93].mxu1 }
 0x508   : > { %v2192_v62 = vadd.f32 %v2191_v12, %v4805_v5  ;;  %v2193_v1 = vpop.f32.mrb[94].mxu1 }
 0x509   : > { %v2194_v2 = vadd.f32 %v2193_v1, %v4802_v55  ;;  %v2195_v3 = vpop.f32.mrb[95].mxu1 }
 0x50a   : > { %v3092_v51 = vpack.c.bf16 %v2192_v62, %v2190_v11  ;;  %v2196_v46 = vadd.f32 %v2195_v3, %v4805_v5 }
 0x50c   : > { %2484 = vst [vmem:[%s4470_s30 + $0xe0] sm:$0xff] %v3092_v51  ;;  %v3093_v6 = vpack.c.bf16 %v2196_v46, %v2194_v2 }
 0x50e   : > { %2485 = vst [vmem:[%s4470_s30 + $0xf0] sm:$0xff] %v3093_v6  ;;  %v2199_v58 = vpop.f32.mrb[96].mxu1 }
 0x50f   : > { %v2200_v54 = vadd.f32 %v2199_v58, %v4802_v55  ;;  %v2201_v8 = vpop.f32.mrb[97].mxu1 }
 0x510   : > { %v2202_v9 = vadd.f32 %v2201_v8, %v4805_v5  ;;  %v2203_v49 = vpop.f32.mrb[98].mxu1 }
 0x511   : > { %v2204_v10 = vadd.f32 %v2203_v49, %v4802_v55  ;;  %v2205_v14 = vpop.f32.mrb[99].mxu1 }
 0x512   : > { %v3094_v16 = vpack.c.bf16 %v2202_v9, %v2200_v54  ;;  %v2206_v53 = vadd.f32 %v2205_v14, %v4805_v5 }
 0x514   : > { %2486 = vst [vmem:[%s4470_s30 + $0x100] sm:$0xff] %v3094_v16  ;;  %v3095_v0 = vpack.c.bf16 %v2206_v53, %v2204_v10 }
 0x516   : > { %2487 = vst [vmem:[%s4470_s30 + $0x110] sm:$0xff] %v3095_v0  ;;  %v2209_v19 = vpop.f32.mrb[100].mxu1 }
 0x517   : > { %v2210_v20 = vadd.f32 %v2209_v19, %v4802_v55  ;;  %v2211_v7 = vpop.f32.mrb[101].mxu1 }
 0x518   : > { %v2212_v22 = vadd.f32 %v2211_v7, %v4805_v5  ;;  %v2213_v24 = vpop.f32.mrb[102].mxu1 }
 0x519   : > { %v2214_v60 = vadd.f32 %v2213_v24, %v4802_v55  ;;  %v2215_v26 = vpop.f32.mrb[103].mxu1 }
 0x51a   : > { %v3096_v23 = vpack.c.bf16 %v2212_v22, %v2210_v20  ;;  %v2216_v29 = vadd.f32 %v2215_v26, %v4805_v5 }
 0x51c   : > { %2488 = vst [vmem:[%s4470_s30 + $0x120] sm:$0xff] %v3096_v23  ;;  %v3097_v30 = vpack.c.bf16 %v2216_v29, %v2214_v60 }
 0x51e   : > { %2489 = vst [vmem:[%s4470_s30 + $0x130] sm:$0xff] %v3097_v30  ;;  %v2219_v13 = vpop.f32.mrb[104].mxu1 }
 0x51f   : > { %v2220_v50 = vadd.f32 %v2219_v13, %v4802_v55  ;;  %v2221_v31 = vpop.f32.mrb[105].mxu1 }
 0x520   : > { %v2222_v32 = vadd.f32 %v2221_v31, %v4805_v5  ;;  %v2223_v21 = vpop.f32.mrb[106].mxu1 }
 0x521   : > { %v2224_v34 = vadd.f32 %v2223_v21, %v4802_v55  ;;  %v2225_v36 = vpop.f32.mrb[107].mxu1 }
 0x522   : > { %v3098_v57 = vpack.c.bf16 %v2222_v32, %v2220_v50  ;;  %v2226_v37 = vadd.f32 %v2225_v36, %v4805_v5 }
 0x524   : > { %2490 = vst [vmem:[%s4470_s30 + $0x140] sm:$0xff] %v3098_v57  ;;  %v3099_v41 = vpack.c.bf16 %v2226_v37, %v2224_v34 }
 0x526   : > { %2491 = vst [vmem:[%s4470_s30 + $0x150] sm:$0xff] %v3099_v41  ;;  %v2229_v42 = vpop.f32.mrb[108].mxu1 }
 0x527   : > { %v2230_v18 = vadd.f32 %v2229_v42, %v4802_v55  ;;  %v2231_v27 = vpop.f32.mrb[109].mxu1 }
 0x528   : > { %v2232_v43 = vadd.f32 %v2231_v27, %v4805_v5  ;;  %v2233_v44 = vpop.f32.mrb[110].mxu1 }
 0x529   : > { %v2234_v33 = vadd.f32 %v2233_v44, %v4802_v55  ;;  %v2235_v15 = vpop.f32.mrb[111].mxu1 }
 0x52a   : > { %v3100_v25 = vpack.c.bf16 %v2232_v43, %v2230_v18  ;;  %v2236_v47 = vadd.f32 %v2235_v15, %v4805_v5 }
 0x52c   : > { %2492 = vst [vmem:[%s4470_s30 + $0x160] sm:$0xff] %v3100_v25  ;;  %v3101_v48 = vpack.c.bf16 %v2236_v47, %v2234_v33 }
 0x52e   : > { %2493 = vst [vmem:[%s4470_s30 + $0x170] sm:$0xff] %v3101_v48  ;;  %v2239_v35 = vpop.f32.mrb[112].mxu1 }
 0x52f   : > { %v2240_v4 = vadd.f32 %v2239_v35, %v4802_v55  ;;  %v2241_v52 = vpop.f32.mrb[113].mxu1 }
 0x530   : > { %v2242_v28 = vadd.f32 %v2241_v52, %v4805_v5  ;;  %v2243_v38 = vpop.f32.mrb[114].mxu1 }
 0x531   : > { %v2244_v63 = vadd.f32 %v2243_v38, %v4802_v55  ;;  %v2245_v40 = vpop.f32.mrb[115].mxu1 }
 0x532   : > { %v3102_v45 = vpack.c.bf16 %v2242_v28, %v2240_v4  ;;  %v2246_v56 = vadd.f32 %v2245_v40, %v4805_v5 }
 0x534   : > { %2494 = vst [vmem:[%s4470_s30 + $0x180] sm:$0xff] %v3102_v45  ;;  %v3103_v39 = vpack.c.bf16 %v2246_v56, %v2244_v63 }
 0x536   : > { %2495 = vst [vmem:[%s4470_s30 + $0x190] sm:$0xff] %v3103_v39  ;;  %v2249_v17 = vpop.f32.mrb[116].mxu1 }
 0x537   : > { %v2250_v59 = vadd.f32 %v2249_v17, %v4802_v55  ;;  %v2251_v61 = vpop.f32.mrb[117].mxu1 }
 0x538   : > { %v2252_v11 = vadd.f32 %v2251_v61, %v4805_v5  ;;  %v2253_v12 = vpop.f32.mrb[118].mxu1 }
 0x539   : > { %v2254_v62 = vadd.f32 %v2253_v12, %v4802_v55  ;;  %v2255_v1 = vpop.f32.mrb[119].mxu1 }
 0x53a   : > { %v3104_v2 = vpack.c.bf16 %v2252_v11, %v2250_v59  ;;  %v2256_v3 = vadd.f32 %v2255_v1, %v4805_v5 }
 0x53c   : > { %2496 = vst [vmem:[%s4470_s30 + $0x1a0] sm:$0xff] %v3104_v2  ;;  %v3105_v51 = vpack.c.bf16 %v2256_v3, %v2254_v62 }
 0x53e   : > { %2497 = vst [vmem:[%s4470_s30 + $0x1b0] sm:$0xff] %v3105_v51  ;;  %v2259_v46 = vpop.f32.mrb[120].mxu1 }
 0x53f   : > { %v2260_v6 = vadd.f32 %v2259_v46, %v4802_v55  ;;  %v2261_v58 = vpop.f32.mrb[121].mxu1 }
 0x540   : > { %v2262_v54 = vadd.f32 %v2261_v58, %v4805_v5  ;;  %v2263_v8 = vpop.f32.mrb[122].mxu1 }
 0x541   : > { %v2264_v9 = vadd.f32 %v2263_v8, %v4802_v55  ;;  %v2265_v49 = vpop.f32.mrb[123].mxu1 }
 0x542   : > { %v3106_v10 = vpack.c.bf16 %v2262_v54, %v2260_v6  ;;  %v2266_v14 = vadd.f32 %v2265_v49, %v4805_v5 }
 0x544   : > { %2498 = vst [vmem:[%s4470_s30 + $0x1c0] sm:$0xff] %v3106_v10  ;;  %v3107_v16 = vpack.c.bf16 %v2266_v14, %v2264_v9 }
 0x546   : > { %2499 = vst [vmem:[%s4470_s30 + $0x1d0] sm:$0xff] %v3107_v16  ;;  %v2269_v53 = vpop.f32.mrb[124].mxu1 }
 0x547   : > { %v2270_v0 = vadd.f32 %v2269_v53, %v4802_v55  ;;  %v2271_v19 = vpop.f32.mrb[125].mxu1 }
 0x548   : > { %v2272_v20 = vadd.f32 %v2271_v19, %v4805_v5  ;;  %v2273_v7 = vpop.f32.mrb[126].mxu1 }
 0x549   : > { %v2274_v22 = vadd.f32 %v2273_v7, %v4802_v55  ;;  %v2275_v24 = vpop.f32.mrb[127].mxu1 }
 0x54a   : > { %v3108_v60 = vpack.c.bf16 %v2272_v20, %v2270_v0  ;;  %v2276_v26 = vadd.f32 %v2275_v24, %v4805_v5 }
 0x54c   : > { %2500 = vst [vmem:[%s4470_s30 + $0x1e0] sm:$0xff] %v3108_v60  ;;  %v3109_v23 = vpack.c.bf16 %v2276_v26, %v2274_v22 }
 0x54e   : > { %2501 = vst [vmem:[%s4470_s30 + $0x1f0] sm:$0xff] %v3109_v23 }
 0x54f PF: > { %p27_p2 = scmp.ge.s32.totalorder %s4198_s11, 10   ;;  %s4961_s13 = smov %s3896_s14 }
 0x550   : > { %s4962_s14 = smov %s3900_s15  ;;  %s4963_s15 = smov %s4210_s17 }
 0x551   : > { %s4964_s16 = smov %s4198_s11  ;;  %29 = sbr.rel (!%p27_p2) target bundleno = 14 (0xe), region = 145 }
 0x558   :  { %2750 = vsyncpa [#allocation3], 1 }
 0x559   :  { %2752 = vsyncpa [#allocation3 + $0x1], 1 }
 0x55a   :  { %2753 = vsyncpa [#allocation5], 1 }
 0x55b   :  { %2755 = vsyncpa [#allocation5 + $0x1], 1 }
 0x55c   :  { %2756 = vsyncpa [#allocation8], 1 }
 0x55d   :  { %2757 = vsyncpa [#allocation11], 1 }
 0x55e   :  { %2758 = vsyncpa [#allocation14], 1 }
 0x55f   :  { %2759 = vsyncpa [#allocation17], 1 }

</bundles_post_ra>
